<compile_context>
chip_gen: v6e
topology: v6e:2x2x1
jax: 0.10.0
libtpu: 0.0.40
codegen_flags: <defaults>
</compile_context>

<pallas_src>
import functools
import math
from typing import NamedTuple

import jax
import jax.numpy as jnp
from jax.experimental import pallas as pl
from jax.experimental.pallas import tpu as pltpu


LANE = 128            # pad feature dims to a multiple of the 128-lane vreg width
SUBLANE_BF16 = 16     # pad small batches to one full packed bf16 vreg height
BATCH_TILE = 128      # batch tile for the parallel grid once batch grows


def _round_up(n, m):
    return ((n + m - 1) // m) * m


class AutoEncoderSpec(NamedTuple):
    """Static (hashable) metadata describing the prepared parameter layout."""
    layer_specs: tuple      # per layer: (group_idx, local_idx, out_pad, act)
    input_dim: int
    in_pad0: int
    latent_dim: int
    latent_pad: int
    output_dim: int
    out_pad_last: int
    n_encoder: int
    n_groups: int
    flops_per_row: int      # 2 * sum(in_pad * out_pad) over layers


# ----------------------------------------------------------------------------
# Fused Pallas kernel: the whole encoder + decoder stack in one call.
# ----------------------------------------------------------------------------
def _fused_autoencoder_kernel(*refs, layer_specs, n_groups, n_encoder):
    """refs = (x, w_group_0..w_group_{G-1}, b_stack, enc_out, dec_out)."""
    x_ref = refs[0]
    w_group_refs = refs[1:1 + n_groups]
    b_ref = refs[1 + n_groups]
    enc_ref = refs[2 + n_groups]
    dec_ref = refs[3 + n_groups]

    h = x_ref[...]                                        # (TB, in_pad0) bf16
    for i, (g, li, out_pad, act) in enumerate(layer_specs):
        w = w_group_refs[g][li]                           # (in_pad, out_pad) bf16, pre-cast
        b = b_ref[i:i + 1, 0:out_pad]                     # (1, out_pad) f32
        # MXU matmul: bf16 inputs, f32 accumulation.
        y = jnp.dot(h.astype(jnp.bfloat16), w,
                    preferred_element_type=jnp.float32)
        y = y + b                                         # f32 bias broadcast (VPU)
        if act == "relu":
            y = jnp.maximum(y, 0.0)
        else:
            # Sigmoid: clamp the exponent arg so exp never hits +inf, then
            # exp + approximate reciprocal both ride the EUP slot.
            y = pl.reciprocal(1.0 + jnp.exp(-jnp.maximum(y, -60.0)), approx=True)
        h = y
        if i == n_encoder - 1:
            enc_ref[...] = h                              # padded latent output
    dec_ref[...] = h


# ----------------------------------------------------------------------------
# One-time parameter preparation (hoisted out of the per-call hot path).
# ----------------------------------------------------------------------------
def prepare_params(params, acts, n_encoder, matmul_dtype=jnp.bfloat16):
    """Pad, pre-cast (bf16) and pack weights/biases; returns (w_groups, b_stack, spec)."""
    in_dims = [w.shape[0] for w, _ in params]
    out_dims = [w.shape[1] for w, _ in params]
    in_pads = [_round_up(d, LANE) for d in in_dims]
    out_pads = [_round_up(d, LANE) for d in out_dims]

    # Zero-pad + cast weights once (zero padding keeps the true outputs exact).
    w_pad = [jnp.pad(w, ((0, ip - w.shape[0]), (0, op - w.shape[1]))).astype(matmul_dtype)
             for (w, _), ip, op in zip(params, in_pads, out_pads)]

    # Group layers that share a padded weight shape into stacked arrays
    # (fewer pallas_call operands -> fewer DMA descriptors).
    shape_to_group = {}
    group_members = []
    layer_specs = []
    for i in range(len(params)):
        shp = (in_pads[i], out_pads[i])
        if shp not in shape_to_group:
            shape_to_group[shp] = len(group_members)
            group_members.append([])
        g = shape_to_group[shp]
        li = len(group_members[g])
        group_members[g].append(i)
        layer_specs.append((g, li, out_pads[i], acts[i]))
    w_groups = tuple(jnp.stack([w_pad[i] for i in members])
                     for members in group_members)

    # Stack all biases into one f32 array, zero-padded to the widest layer.
    max_out_pad = max(out_pads)
    b_stack = jnp.stack([jnp.pad(b, (0, max_out_pad - b.shape[0]))
                         for (_, b) in params]).astype(jnp.float32)

    spec = AutoEncoderSpec(
        layer_specs=tuple(layer_specs),
        input_dim=in_dims[0],
        in_pad0=in_pads[0],
        latent_dim=out_dims[n_encoder - 1],
        latent_pad=out_pads[n_encoder - 1],
        output_dim=out_dims[-1],
        out_pad_last=out_pads[-1],
        n_encoder=n_encoder,
        n_groups=len(w_groups),
        flops_per_row=2 * sum(ip * op for ip, op in zip(in_pads, out_pads)),
    )
    return w_groups, b_stack, spec


# ----------------------------------------------------------------------------
# Host wrapper: pad input -> single fused pallas_call -> slice outputs.
# ----------------------------------------------------------------------------
@functools.partial(jax.jit, static_argnames=("spec",))
def autoencoder_forward(x, w_groups, b_stack, spec):
    """x: (B, input_dim) f32. Returns (encoded, decoded) like AutoEncoder.forward(x, True)."""
    B, input_dim = x.shape
    assert input_dim == spec.input_dim

    # Batch padding / tiling policy: small batches -> one 16-row (packed bf16)
    # tile; larger batches -> 128-row tiles sharded across TensorCores.
    if B <= BATCH_TILE:
        B_pad = _round_up(B, SUBLANE_BF16)
        TB = B_pad
    else:
        TB = BATCH_TILE
        B_pad = _round_up(B, TB)
    grid = (B_pad // TB,)

    # Input padding (data-dependent, stays in the per-call path); bf16 halves
    # the input DMA bytes and matches the kernel's matmul dtype.
    x_p = jnp.pad(x, ((0, B_pad - B), (0, spec.in_pad0 - input_dim))
                  ).astype(jnp.bfloat16)

    # Explicit VMEM budget (v7x: 64 MiB physical, 32 MiB scoped default).
    w_bytes = sum(g.size * g.dtype.itemsize for g in w_groups)
    b_bytes = b_stack.size * b_stack.dtype.itemsize
    x_bytes = TB * spec.in_pad0 * 2
    out_bytes = TB * (spec.latent_pad + spec.out_pad_last) * 4
    act_bytes = 4 * TB * max(spec.in_pad0, spec.out_pad_last) * 4
    vmem_needed = 2 * (x_bytes + out_bytes) + w_bytes + b_bytes + act_bytes
    vmem_limit = int(min(48 * 2**20, max(8 * 2**20, 4 * vmem_needed)))

    flops = B_pad * spec.flops_per_row
    transcendentals = 2 * B_pad * spec.out_pad_last          # exp + reciprocal
    bytes_accessed = (x_p.size * 2 + w_bytes + b_bytes
                      + B_pad * (spec.latent_pad + spec.out_pad_last) * 4)

    kernel = functools.partial(
        _fused_autoencoder_kernel,
        layer_specs=spec.layer_specs,
        n_groups=spec.n_groups,
        n_encoder=spec.n_encoder)

    in_specs = [pl.BlockSpec((TB, spec.in_pad0), lambda i: (i, 0))]
    in_specs += [pl.BlockSpec(g.shape, lambda i: (0, 0, 0)) for g in w_groups]
    in_specs.append(pl.BlockSpec(b_stack.shape, lambda i: (0, 0)))
    out_specs = (pl.BlockSpec((TB, spec.latent_pad), lambda i: (i, 0)),
                 pl.BlockSpec((TB, spec.out_pad_last), lambda i: (i, 0)))

    # TODO(synk): if padded weights ever approach ~16-24 MiB (large input_dim /
    # hidden_dim), split the layer stack across a second grid axis or use a
    # manual make_async_copy prefetch so layer-0 compute overlaps later-layer
    # weight DMA (matters most on v5e's lower HBM bandwidth).
    enc_p, dec_p = pl.pallas_call(
        kernel,
        out_shape=(jax.ShapeDtypeStruct((B_pad, spec.latent_pad), jnp.float32),
                   jax.ShapeDtypeStruct((B_pad, spec.out_pad_last), jnp.float32)),
        grid=grid,
        in_specs=in_specs,
        out_specs=out_specs,
        compiler_params=pltpu.CompilerParams(
            dimension_semantics=("parallel",),
            vmem_limit_bytes=vmem_limit),
        cost_estimate=pl.CostEstimate(flops=flops,
                                      transcendentals=transcendentals,
                                      bytes_accessed=bytes_accessed),
    )(x_p, *w_groups, b_stack)

    encoded = enc_p[:B, :spec.latent_dim]
    decoded = dec_p[:B, :spec.output_dim]
    return encoded, decoded


# ----------------------------------------------------------------------------
# Deterministic parameter init (PyTorch nn.Linear default: U(-k,k), k=1/sqrt(fan_in))
# ----------------------------------------------------------------------------
def _init_linear(key, in_dim, out_dim):
    kw, kb = jax.random.split(key)
    bound = 1.0 / math.sqrt(in_dim)
    w = jax.random.uniform(kw, (in_dim, out_dim), jnp.float32, -bound, bound)
    b = jax.random.uniform(kb, (out_dim,), jnp.float32, -bound, bound)
    return w, b


def build_autoencoder_params(key, input_dim, latent_dim, hidden_dim,
                             encoder_layers, decoder_layers):
    """(w, b) list for the full encoder+decoder stack + per-layer activations."""
    enc_dims = [input_dim] + [hidden_dim] * (encoder_layers - 1) + [latent_dim]
    dec_dims = [latent_dim] + [hidden_dim] * (decoder_layers - 1) + [input_dim]
    layer_dims = (list(zip(enc_dims[:-1], enc_dims[1:]))
                  + list(zip(dec_dims[:-1], dec_dims[1:])))
    n_layers = len(layer_dims)
    acts = tuple(["relu"] * (n_layers - 1) + ["sigmoid"])
    keys = jax.random.split(key, n_layers)
    params = [_init_linear(k, di, do) for k, (di, do) in zip(keys, layer_dims)]
    return params, acts, encoder_layers


# ----------------------------------------------------------------------------
# Pure-JAX references for correctness checks
# ----------------------------------------------------------------------------
def _ref_forward(x, params, acts, n_encoder, matmul_dtype=jnp.float32):
    h = x
    encoded = None
    for i, (w, b) in enumerate(params):
        y = jnp.dot(h.astype(matmul_dtype), w.astype(matmul_dtype),
                    preferred_element_type=jnp.float32) + b
        h = jnp.maximum(y, 0.0) if acts[i] == "relu" else jax.nn.sigmoid(y)
        if i == n_encoder - 1:
            encoded = h
    return encoded, h


if __name__ == "__main__":
    # Config (small, consistent with the module):
    B = 2
    C, H, W = 4, 16, 16
    input_dim = C * H * W          # 1024
    latent_dim = 8
    hidden_dim = 32
    encoder_layers = 3
    decoder_layers = 3

    key = jax.random.PRNGKey(0)
    k_x, k_params, k_big = jax.random.split(key, 3)

    # Image batch; the module consumes the flattened view (B, C*H*W).
    x_img = jax.random.uniform(k_x, (B, C, H, W), jnp.float32)
    x = x_img.reshape(B, input_dim)

    params, acts, n_encoder = build_autoencoder_params(
        k_params, input_dim, latent_dim, hidden_dim, encoder_layers, decoder_layers)

    # One-time preparation: pad, bf16-cast and pack parameters.
    w_groups, b_stack, spec = prepare_params(params, acts, n_encoder)

    encoded, decoded = autoencoder_forward(x, w_groups, b_stack, spec)
    encoded = jax.block_until_ready(encoded)
    decoded = jax.block_until_ready(decoded)

    assert encoded.shape == (B, latent_dim)
    assert decoded.shape == (B, input_dim)

    # Matched reference: same bf16-input / f32-accumulate recipe as the kernel.
    enc_bf, dec_bf = _ref_forward(x, params, acts, n_encoder, jnp.bfloat16)
    assert jnp.allclose(encoded, enc_bf, atol=2e-3, rtol=2e-3)
    assert jnp.allclose(decoded, dec_bf, atol=2e-3, rtol=2e-3)

    # Full-f32 reference (the PyTorch module's math), bf16-matmul tolerance.
    enc_f32, dec_f32 = _ref_forward(x, params, acts, n_encoder, jnp.float32)
    assert jnp.allclose(encoded, enc_f32, atol=5e-2, rtol=5e-2)
    assert jnp.allclose(decoded, dec_f32, atol=5e-2, rtol=5e-2)

    # Also exercise the batch-tiled path (grid > 1, parallel across cores).
    Bb = 256
    xb = jax.random.uniform(k_big, (Bb, input_dim), jnp.float32)
    enc_b, dec_b = autoencoder_forward(xb, w_groups, b_stack, spec)
    enc_b = jax.block_until_ready(enc_b)
    dec_b = jax.block_until_ready(dec_b)
    assert enc_b.shape == (Bb, latent_dim) and dec_b.shape == (Bb, input_dim)
    enc_bref, dec_bref = _ref_forward(xb, params, acts, n_encoder, jnp.bfloat16)
    assert jnp.allclose(enc_b, enc_bref, atol=5e-3, rtol=5e-3)
    assert jnp.allclose(dec_b, dec_bref, atol=5e-3, rtol=5e-3)

    print("KERNEL_OK")
</pallas_src>

<mosaic_0001>
module attributes {stable_mosaic.version = 11 : i64} {
  func.func @_fused_autoencoder_kernel(%arg0: i32, %arg1: memref<16x1024xbf16, #tpu.memory_space<vmem>>, %arg2: memref<1x1024x128xbf16, #tpu.memory_space<vmem>>, %arg3: memref<4x128x128xbf16, #tpu.memory_space<vmem>>, %arg4: memref<1x128x1024xbf16, #tpu.memory_space<vmem>>, %arg5: memref<6x1024xf32, #tpu.memory_space<vmem>>, %arg6: memref<16x128xf32, #tpu.memory_space<vmem>>, %arg7: memref<16x1024xf32, #tpu.memory_space<vmem>>) attributes {dimension_semantics = [#tpu.dimension_semantics<parallel>], iteration_bounds = array<i64: 1>, scalar_prefetch = 0 : i64, scratch_operands = 0 : i64, tpu.core_type = #tpu.core_type<tc>, window_params = [{transform_indices = @transform_0, window_bounds = array<i64: 16, 1024>}, {pipeline_mode = #tpu.pipeline_mode<synchronous>, transform_indices = @transform_1, window_bounds = array<i64: 1, 1024, 128>}, {pipeline_mode = #tpu.pipeline_mode<synchronous>, transform_indices = @transform_2, window_bounds = array<i64: 4, 128, 128>}, {pipeline_mode = #tpu.pipeline_mode<synchronous>, transform_indices = @transform_3, window_bounds = array<i64: 1, 128, 1024>}, {pipeline_mode = #tpu.pipeline_mode<synchronous>, transform_indices = @transform_4, window_bounds = array<i64: 6, 1024>}, {transform_indices = @transform_5, window_bounds = array<i64: 16, 128>}, {transform_indices = @transform_6, window_bounds = array<i64: 16, 1024>}]} {
    %c0 = arith.constant 0 : index
    %c0_0 = arith.constant 0 : index
    %0 = vector.load %arg1[%c0, %c0_0] : memref<16x1024xbf16, #tpu.memory_space<vmem>>, vector<16x1024xbf16>
    %c0_1 = arith.constant 0 : index
    %c0_2 = arith.constant 0 : index
    %c0_3 = arith.constant 0 : index
    %1 = vector.load %arg2[%c0_1, %c0_2, %c0_3] : memref<1x1024x128xbf16, #tpu.memory_space<vmem>>, vector<1x1024x128xbf16>
    %2 = vector.shape_cast %1 : vector<1x1024x128xbf16> to vector<1024x128xbf16>
    %c0_4 = arith.constant 0 : index
    %c0_5 = arith.constant 0 : index
    %3 = vector.load %arg5[%c0_4, %c0_5] : memref<6x1024xf32, #tpu.memory_space<vmem>>, vector<1x128xf32>
    %cst = arith.constant dense<0.000000e+00> : vector<16x128xf32>
    %4 = tpu.matmul %0, %2, %cst {dimension_numbers = #tpu.dot_dimension_numbers<[1], [0], [0], [1], [0, 0, 1, 1], [], []>} : vector<16x1024xbf16>, vector<1024x128xbf16>, vector<16x128xf32> -> vector<16x128xf32>
    %5 = vector.broadcast %3 : vector<1x128xf32> to vector<16x128xf32>
    %6 = arith.addf %4, %5 : vector<16x128xf32>
    %cst_6 = arith.constant 0.000000e+00 : f32
    %7 = vector.broadcast %cst_6 : f32 to vector<16x128xf32>
    %8 = arith.maximumf %6, %7 : vector<16x128xf32>
    %c0_7 = arith.constant 0 : index
    %c0_8 = arith.constant 0 : index
    %c0_9 = arith.constant 0 : index
    %9 = vector.load %arg3[%c0_7, %c0_8, %c0_9] : memref<4x128x128xbf16, #tpu.memory_space<vmem>>, vector<1x128x128xbf16>
    %10 = vector.shape_cast %9 : vector<1x128x128xbf16> to vector<128x128xbf16>
    %c1 = arith.constant 1 : index
    %c0_10 = arith.constant 0 : index
    %11 = vector.load %arg5[%c1, %c0_10] : memref<6x1024xf32, #tpu.memory_space<vmem>>, vector<1x128xf32>
    %12 = arith.truncf %8 : vector<16x128xf32> to vector<16x128xbf16>
    %cst_11 = arith.constant dense<0.000000e+00> : vector<16x128xf32>
    %13 = tpu.matmul %12, %10, %cst_11 {dimension_numbers = #tpu.dot_dimension_numbers<[1], [0], [0], [1], [0, 0, 1, 1], [], []>} : vector<16x128xbf16>, vector<128x128xbf16>, vector<16x128xf32> -> vector<16x128xf32>
    %14 = vector.broadcast %11 : vector<1x128xf32> to vector<16x128xf32>
    %15 = arith.addf %13, %14 : vector<16x128xf32>
    %cst_12 = arith.constant 0.000000e+00 : f32
    %16 = vector.broadcast %cst_12 : f32 to vector<16x128xf32>
    %17 = arith.maximumf %15, %16 : vector<16x128xf32>
    %c1_13 = arith.constant 1 : index
    %c0_14 = arith.constant 0 : index
    %c0_15 = arith.constant 0 : index
    %18 = vector.load %arg3[%c1_13, %c0_14, %c0_15] : memref<4x128x128xbf16, #tpu.memory_space<vmem>>, vector<1x128x128xbf16>
    %19 = vector.shape_cast %18 : vector<1x128x128xbf16> to vector<128x128xbf16>
    %c2 = arith.constant 2 : index
    %c0_16 = arith.constant 0 : index
    %20 = vector.load %arg5[%c2, %c0_16] : memref<6x1024xf32, #tpu.memory_space<vmem>>, vector<1x128xf32>
    %21 = arith.truncf %17 : vector<16x128xf32> to vector<16x128xbf16>
    %cst_17 = arith.constant dense<0.000000e+00> : vector<16x128xf32>
    %22 = tpu.matmul %21, %19, %cst_17 {dimension_numbers = #tpu.dot_dimension_numbers<[1], [0], [0], [1], [0, 0, 1, 1], [], []>} : vector<16x128xbf16>, vector<128x128xbf16>, vector<16x128xf32> -> vector<16x128xf32>
    %23 = vector.broadcast %20 : vector<1x128xf32> to vector<16x128xf32>
    %24 = arith.addf %22, %23 : vector<16x128xf32>
    %cst_18 = arith.constant 0.000000e+00 : f32
    %25 = vector.broadcast %cst_18 : f32 to vector<16x128xf32>
    %26 = arith.maximumf %24, %25 : vector<16x128xf32>
    %c0_19 = arith.constant 0 : index
    %c0_20 = arith.constant 0 : index
    %27 = vector.load %arg6[%c0_19, %c0_20] : memref<16x128xf32, #tpu.memory_space<vmem>>, vector<16x128xf32>
    tpu.vector_store %arg6[%c0_19, %c0_20], %26 {strides = array<i32>} : memref<16x128xf32, #tpu.memory_space<vmem>>, vector<16x128xf32>,
    %c2_21 = arith.constant 2 : index
    %c0_22 = arith.constant 0 : index
    %c0_23 = arith.constant 0 : index
    %28 = vector.load %arg3[%c2_21, %c0_22, %c0_23] : memref<4x128x128xbf16, #tpu.memory_space<vmem>>, vector<1x128x128xbf16>
    %29 = vector.shape_cast %28 : vector<1x128x128xbf16> to vector<128x128xbf16>
    %c3 = arith.constant 3 : index
    %c0_24 = arith.constant 0 : index
    %30 = vector.load %arg5[%c3, %c0_24] : memref<6x1024xf32, #tpu.memory_space<vmem>>, vector<1x128xf32>
    %31 = arith.truncf %26 : vector<16x128xf32> to vector<16x128xbf16>
    %cst_25 = arith.constant dense<0.000000e+00> : vector<16x128xf32>
    %32 = tpu.matmul %31, %29, %cst_25 {dimension_numbers = #tpu.dot_dimension_numbers<[1], [0], [0], [1], [0, 0, 1, 1], [], []>} : vector<16x128xbf16>, vector<128x128xbf16>, vector<16x128xf32> -> vector<16x128xf32>
    %33 = vector.broadcast %30 : vector<1x128xf32> to vector<16x128xf32>
    %34 = arith.addf %32, %33 : vector<16x128xf32>
    %cst_26 = arith.constant 0.000000e+00 : f32
    %35 = vector.broadcast %cst_26 : f32 to vector<16x128xf32>
    %36 = arith.maximumf %34, %35 : vector<16x128xf32>
    %c3_27 = arith.constant 3 : index
    %c0_28 = arith.constant 0 : index
    %c0_29 = arith.constant 0 : index
    %37 = vector.load %arg3[%c3_27, %c0_28, %c0_29] : memref<4x128x128xbf16, #tpu.memory_space<vmem>>, vector<1x128x128xbf16>
    %38 = vector.shape_cast %37 : vector<1x128x128xbf16> to vector<128x128xbf16>
    %c4 = arith.constant 4 : index
    %c0_30 = arith.constant 0 : index
    %39 = vector.load %arg5[%c4, %c0_30] : memref<6x1024xf32, #tpu.memory_space<vmem>>, vector<1x128xf32>
    %40 = arith.truncf %36 : vector<16x128xf32> to vector<16x128xbf16>
    %cst_31 = arith.constant dense<0.000000e+00> : vector<16x128xf32>
    %41 = tpu.matmul %40, %38, %cst_31 {dimension_numbers = #tpu.dot_dimension_numbers<[1], [0], [0], [1], [0, 0, 1, 1], [], []>} : vector<16x128xbf16>, vector<128x128xbf16>, vector<16x128xf32> -> vector<16x128xf32>
    %42 = vector.broadcast %39 : vector<1x128xf32> to vector<16x128xf32>
    %43 = arith.addf %41, %42 : vector<16x128xf32>
    %cst_32 = arith.constant 0.000000e+00 : f32
    %44 = vector.broadcast %cst_32 : f32 to vector<16x128xf32>
    %45 = arith.maximumf %43, %44 : vector<16x128xf32>
    %c0_33 = arith.constant 0 : index
    %c0_34 = arith.constant 0 : index
    %c0_35 = arith.constant 0 : index
    %46 = vector.load %arg4[%c0_33, %c0_34, %c0_35] : memref<1x128x1024xbf16, #tpu.memory_space<vmem>>, vector<1x128x1024xbf16>
    %47 = vector.shape_cast %46 : vector<1x128x1024xbf16> to vector<128x1024xbf16>
    %c5 = arith.constant 5 : index
    %c0_36 = arith.constant 0 : index
    %48 = vector.load %arg5[%c5, %c0_36] : memref<6x1024xf32, #tpu.memory_space<vmem>>, vector<1x1024xf32>
    %49 = arith.truncf %45 : vector<16x128xf32> to vector<16x128xbf16>
    %cst_37 = arith.constant dense<0.000000e+00> : vector<16x1024xf32>
    %50 = tpu.matmul %49, %47, %cst_37 {dimension_numbers = #tpu.dot_dimension_numbers<[1], [0], [0], [1], [0, 0, 1, 1], [], []>} : vector<16x128xbf16>, vector<128x1024xbf16>, vector<16x1024xf32> -> vector<16x1024xf32>
    %51 = vector.broadcast %48 : vector<1x1024xf32> to vector<16x1024xf32>
    %52 = arith.addf %50, %51 : vector<16x1024xf32>
    %cst_38 = arith.constant -6.000000e+01 : f32
    %53 = vector.broadcast %cst_38 : f32 to vector<16x1024xf32>
    %54 = arith.maximumf %52, %53 : vector<16x1024xf32>
    %cst_39 = arith.constant 0.000000e+00 : f32
    %55 = vector.broadcast %cst_39 : f32 to vector<16x1024xf32>
    %56 = arith.subf %55, %54 : vector<16x1024xf32>
    %57 = math.exp %56 : vector<16x1024xf32>
    %cst_40 = arith.constant 1.000000e+00 : f32
    %58 = vector.broadcast %cst_40 : f32 to vector<16x1024xf32>
    %59 = arith.addf %58, %57 : vector<16x1024xf32>
    %60 = tpu.reciprocal %59 {approx = true} : vector<16x1024xf32> -> vector<16x1024xf32>
    %c0_41 = arith.constant 0 : index
    %c0_42 = arith.constant 0 : index
    %61 = vector.load %arg7[%c0_41, %c0_42] : memref<16x1024xf32, #tpu.memory_space<vmem>>, vector<16x1024xf32>
    tpu.vector_store %arg7[%c0_41, %c0_42], %60 {strides = array<i32>} : memref<16x1024xf32, #tpu.memory_space<vmem>>, vector<16x1024xf32>,
    return
  }
  func.func @transform_0(%arg0: i32) -> (i32, i32) {
    %c0_i32 = arith.constant 0 : i32
    %c0_i32_0 = arith.constant 0 : i32
    return %arg0, %c0_i32 : i32, i32
  }
  func.func @transform_1(%arg0: i32) -> (i32, i32, i32) {
    %c0_i32 = arith.constant 0 : i32
    %c0_i32_0 = arith.constant 0 : i32
    %c0_i32_1 = arith.constant 0 : i32
    %c0_i32_2 = arith.constant 0 : i32
    return %c0_i32, %c0_i32_0, %c0_i32_1 : i32, i32, i32
  }
  func.func @transform_2(%arg0: i32) -> (i32, i32, i32) {
    %c0_i32 = arith.constant 0 : i32
    %c0_i32_0 = arith.constant 0 : i32
    %c0_i32_1 = arith.constant 0 : i32
    %c0_i32_2 = arith.constant 0 : i32
    return %c0_i32, %c0_i32_0, %c0_i32_1 : i32, i32, i32
  }
  func.func @transform_3(%arg0: i32) -> (i32, i32, i32) {
    %c0_i32 = arith.constant 0 : i32
    %c0_i32_0 = arith.constant 0 : i32
    %c0_i32_1 = arith.constant 0 : i32
    %c0_i32_2 = arith.constant 0 : i32
    return %c0_i32, %c0_i32_0, %c0_i32_1 : i32, i32, i32
  }
  func.func @transform_4(%arg0: i32) -> (i32, i32) {
    %c0_i32 = arith.constant 0 : i32
    %c0_i32_0 = arith.constant 0 : i32
    %c0_i32_1 = arith.constant 0 : i32
    return %c0_i32, %c0_i32_0 : i32, i32
  }
  func.func @transform_5(%arg0: i32) -> (i32, i32) {
    %c0_i32 = arith.constant 0 : i32
    %c0_i32_0 = arith.constant 0 : i32
    return %arg0, %c0_i32 : i32, i32
  }
  func.func @transform_6(%arg0: i32) -> (i32, i32) {
    %c0_i32 = arith.constant 0 : i32
    %c0_i32_0 = arith.constant 0 : i32
    return %arg0, %c0_i32 : i32, i32
  }
}

</mosaic_0001>

<bundles_post_ra>
// kernel: autoencoder_forward.1
= control target key start
LH: loop header
LB: loop body
LE: loop exit
PB: predicated region body
PF: predicated region fallthrough
CT: control target
= control target key end

     0   :  { %12 = vsyncpa [#allocation3], 0  ;;  %s2783_s0 = inlined_call_operand.vmem [shape: bf16[16,1024], index: 0, kind: input, shape index: {}]   ;;  %s2784_s1 = inlined_call_operand.hbm [shape: bf16[1,1024,128], index: 1, kind: input, shape index: {}]   ;;  %s2785_s2 = inlined_call_operand.hbm [shape: bf16[4,128,128], index: 2, kind: input, shape index: {}]   ;;  %s2786_s3 = inlined_call_operand.hbm [shape: bf16[1,128,1024], index: 3, kind: input, shape index: {}]   ;;  %s2787_s4 = inlined_call_operand.vmem [shape: f32[6,1024], index: 4, kind: input, shape index: {}]   ;;  %s2788_s5 = inlined_call_operand.vmem [shape: f32[16,128], index: 5, kind: output, shape index: {0}]   ;;  %s2789_s6 = inlined_call_operand.vmem [shape: f32[16,1024], index: 6, kind: output, shape index: {1}]  }
   0x1   :  { %13 = vsyncpa [#allocation5], 0  ;;  %s2564_s21 = smov [#allocation4]   ;;  %s2565_s23 = smov [#allocation2]  }
   0x2   :  { %s33_s22 = sshll.u32 %s2564_s21, 4  ;;  %s21_s24 = sshll.u32 %s2565_s23, 4  ;;  %s34_s22 = int_to_ptr.vmem [resolvable:$true] %s33_s22  ;;  %s22_s24 = int_to_ptr.vmem [resolvable:$true] %s21_s24 }
   0x3   :  { %s2508_s25 = scalar_lea.vmem %s34_s22, 4096  ;;  %p2513_p1 = scmp.lt.s32.totalorder %s34_s22, %s34_s22 }
   0x4   :  { %p2509_p0 = scmp.ne.s32.totalorder %s34_s22, %s2508_s25  ;;  %p2514_p2 = scmp.lt.s32.totalorder %s2508_s25, %s2508_s25 }
   0x6   :  { %p2515_p3 = por %p2514_p2, %p2513_p1 }
   0x8   :  { %p2516_p4 = pnand %p2515_p3, %p2509_p0 }
   0xa   :  { %2519 = shalt.err (!%p2516_p4)
}
   0xb   :  { %s2566_s26 = smov 64   ;;  %s2567_s27 = smov 4  }
   0xc   :  { %39 = dma.hbm_to_vmem [thread:$0]  %s2785_s2, 4096, %s34_s22, [#allocation5], %s2566_s26, %s2566_s26, %s2567_s27  }
   0xd   :  { %s2528_s30 = scalar_lea.vmem %s22_s24, 8192  ;;  %p2533_p6 = scmp.lt.s32.totalorder %s22_s24, %s22_s24 }
   0xe   :  { %p2529_p5 = scmp.ne.s32.totalorder %s22_s24, %s2528_s30  ;;  %p2534_p7 = scmp.lt.s32.totalorder %s2528_s30, %s2528_s30 }
  0x10   :  { %p2535_p8 = por %p2534_p7, %p2533_p6 }
  0x12   :  { %p2536_p9 = pnand %p2535_p8, %p2529_p5 }
  0x14   :  { %2539 = shalt.err (!%p2536_p9)
}
  0x15   :  { %27 = dma.hbm_to_vmem [thread:$0]  %s2784_s1, 8192, %s22_s24, [#allocation3], %s2566_s26, %s2566_s26, %s2567_s27  }
  0x16   :  { %s2568_s9 = smov [#allocation6]  }
  0x17   :  { %s45_s10 = sshll.u32 %s2568_s9, 4  ;;  %s46_s10 = int_to_ptr.vmem [resolvable:$true] %s45_s10 }
  0x18   :  { %s2548_s11 = scalar_lea.vmem %s46_s10, 8192  ;;  %p2553_p11 = scmp.lt.s32.totalorder %s46_s10, %s46_s10 }
  0x19   :  { %p2549_p10 = scmp.ne.s32.totalorder %s46_s10, %s2548_s11  ;;  %p2554_p12 = scmp.lt.s32.totalorder %s2548_s11, %s2548_s11 }
  0x1b   :  { %p2555_p13 = por %p2554_p12, %p2553_p11 }
  0x1d   :  { %p2556_p0 = pnand %p2555_p13, %p2549_p10 }
  0x1f   :  { %2559 = shalt.err (!%p2556_p0)
}
  0x20   :  { %s2569_s2 = smov 512   ;;  %s2570_s12 = smov 32  }
  0x21   :  { %51 = dma.hbm_to_vmem [thread:$0]  %s2786_s3, 8192, %s46_s10, [#allocation5], %s2569_s2, %s2569_s2, %s2570_s12  }
  0x22   :  { %2560 = dma.done.wait [#allocation3], 8192  }
  0x23   :  { %2561 = vsyncadd [#allocation3], 4294959104 }
  0x24   :  { %2562 = dma.done.wait [#allocation5], 12288  }
  0x25   :  { %2563 = vsyncadd [#allocation5], 4294955008  ;;  %v2340_v0 = vld [vmem:[#allocation2 + $0x78] sm:$0xff]   ;;  %v2344_v4 = vld [vmem:[#allocation2 + $0x70] sm:$0xff]   ;;  %vm2572_vm0 = vmmov 0  }
  0x26   :  { %v2341_v1 = vld [vmem:[#allocation2 + $0xf8] sm:$0xff]   ;;  %2126 = vmatprep.subr.bf16.mxu0 %v2340_v0  ;;  %v2345_v5 = vld [vmem:[#allocation2 + $0xf0] sm:$0xff]   ;;  %v2348_v8 = vld [vmem:[#allocation2 + $0x68] sm:$0xff]  }
  0x27   :  { %v2342_v2 = vld [vmem:[#allocation2 + $0x38] sm:$0xff]   ;;  %2148 = vmatprep.subr.bf16.mxu1 %v2341_v1  ;;  %v2346_v6 = vld [vmem:[#allocation2 + $0x30] sm:$0xff]   ;;  %v2349_v9 = vld [vmem:[#allocation2 + $0xe8] sm:$0xff]  }
  0x28   :  { %v2343_v3 = vld [vmem:[#allocation2 + $0xb8] sm:$0xff]   ;;  %2127 = vmatpush3.bf16.msra.mxu0 %v2342_v2  ;;  %v2347_v7 = vld [vmem:[#allocation2 + $0xb0] sm:$0xff]   ;;  %v2350_v10 = vld [vmem:[#allocation2 + $0x28] sm:$0xff]  }
  0x29   :  { %2149 = vmatpush3.bf16.msra.mxu1 %v2343_v3  ;;  %2128 = vmatprep.subr.bf16.mxu0 %v2344_v4  ;;  %v2351_v11 = vld [vmem:[#allocation2 + $0xa8] sm:$0xff]   ;;  %v2352_v12 = vld [vmem:[#allocation2 + $0x60] sm:$0xff]   ;;  %v2356_v16 = vld [vmem:[#allocation2 + $0x58] sm:$0xff]  }
  0x2a   :  { %2150 = vmatprep.subr.bf16.mxu1 %v2345_v5  ;;  %v2353_v13 = vld [vmem:[#allocation2 + $0xe0] sm:$0xff]   ;;  %v2357_v17 = vld [vmem:[#allocation2 + $0xd8] sm:$0xff]   ;;  %v2360_v20 = vld [vmem:[#allocation2 + $0x50] sm:$0xff]  }
  0x2b   :  { %v2354_v14 = vld [vmem:[#allocation2 + $0x20] sm:$0xff]   ;;  %v2358_v18 = vld [vmem:[#allocation2 + $0x18] sm:$0xff]   ;;  %v2361_v21 = vld [vmem:[#allocation2 + $0xd0] sm:$0xff]  }
  0x2c   :  { %2129 = vmatpush3.bf16.msra.mxu0 %v2346_v6  ;;  %v2355_v15 = vld [vmem:[#allocation2 + $0xa0] sm:$0xff]   ;;  %v2359_v19 = vld [vmem:[#allocation2 + $0x98] sm:$0xff]   ;;  %v2362_v22 = vld [vmem:[#allocation2 + $0x10] sm:$0xff]  }
  0x2d   :  { %2151 = vmatpush3.bf16.msra.mxu1 %v2347_v7  ;;  %2130 = vmatprep.subr.bf16.mxu0 %v2348_v8  ;;  %v2363_v23 = vld [vmem:[#allocation2 + $0x90] sm:$0xff]   ;;  %v2364_v24 = vld [vmem:[#allocation2 + $0x48] sm:$0xff]   ;;  %v2368_v28 = vld [vmem:[#allocation2 + $0x40] sm:$0xff]  }
  0x2e   :  { %2152 = vmatprep.subr.bf16.mxu1 %v2349_v9  ;;  %v2365_v25 = vld [vmem:[#allocation2 + $0xc8] sm:$0xff]   ;;  %v2369_v29 = vld [vmem:[#allocation2 + $0xc0] sm:$0xff]   ;;  %v2372_v40 = vld [vmem:[#allocation2 + $0x178] sm:$0xff]  }
  0x2f   :  { %v2366_v26 = vld [vmem:[#allocation2 + $0x8] sm:$0xff]   ;;  %v2370_v30 = vld [vmem:[#allocation2] sm:$0xff]   ;;  %v2373_v41 = vld [vmem:[#allocation2 + $0x1f8] sm:$0xff]  }
  0x30   :  { %2131 = vmatpush3.bf16.msra.mxu0 %v2350_v10  ;;  %v2367_v27 = vld [vmem:[#allocation2 + $0x88] sm:$0xff]   ;;  %v2371_v31 = vld [vmem:[#allocation2 + $0x80] sm:$0xff]   ;;  %v2374_v42 = vld [vmem:[#allocation2 + $0x138] sm:$0xff]  }
  0x31   :  { %2153 = vmatpush3.bf16.msra.mxu1 %v2351_v11  ;;  %2132 = vmatprep.subr.bf16.mxu0 %v2352_v12  ;;  %v64_v32 = vld [vmem:[%s2783_s0] sm:$0xff]  ;;  %v65_v34 = vld [vmem:[%s2783_s0 + $0x8] sm:$0xff]  ;;  %v2375_v43 = vld [vmem:[#allocation2 + $0x1b8] sm:$0xff]  }
  0x32   :  { %2154 = vmatprep.subr.bf16.mxu1 %v2353_v13  ;;  %v68_v33 = vld [vmem:[%s2783_s0 + $0x20] sm:$0xff]  ;;  %v69_v37 = vld [vmem:[%s2783_s0 + $0x28] sm:$0xff]  ;;  %v2376_v44 = vld [vmem:[#allocation2 + $0x170] sm:$0xff]  }
  0x33   :  { %v1956_v35 = vcombine.low %v64_v32, %v68_v33  ;;  %v1957_v36 = vcombine.high %v64_v32, %v68_v33  ;;  %v1958_v38 = vcombine.low %v65_v34, %v69_v37  ;;  %v1959_v39 = vcombine.high %v65_v34, %v69_v37  ;;  %v2377_v45 = vld [vmem:[#allocation2 + $0x1f0] sm:$0xff]   ;;  %v2380_v48 = vld [vmem:[#allocation2 + $0x168] sm:$0xff]   ;;  %v2384_v52 = vld [vmem:[#allocation2 + $0x160] sm:$0xff]  }
  0x34   :  { %2133 = vmatpush3.bf16.msra.mxu0 %v2354_v14  ;;  %v2378_v46 = vld [vmem:[#allocation2 + $0x130] sm:$0xff]   ;;  %v2381_v49 = vld [vmem:[#allocation2 + $0x1e8] sm:$0xff]   ;;  %v2385_v53 = vld [vmem:[#allocation2 + $0x1e0] sm:$0xff]  }
  0x35   :  { %2155 = vmatpush3.bf16.msra.mxu1 %v2355_v15  ;;  %2134 = vmatprep.subr.bf16.mxu0 %v2356_v16  ;;  %v2379_v47 = vld [vmem:[#allocation2 + $0x1b0] sm:$0xff]   ;;  %v2382_v50 = vld [vmem:[#allocation2 + $0x128] sm:$0xff]   ;;  %v2386_v54 = vld [vmem:[#allocation2 + $0x120] sm:$0xff]  }
  0x36   :  { %2156 = vmatprep.subr.bf16.mxu1 %v2357_v17  ;;  %657 = vmatprep.mubr.bf16.mxu0 %v1957_v36  ;;  %v2383_v51 = vld [vmem:[#allocation2 + $0x1a8] sm:$0xff]   ;;  %v2387_v55 = vld [vmem:[#allocation2 + $0x1a0] sm:$0xff]   ;;  %v2388_v56 = vld [vmem:[#allocation2 + $0x158] sm:$0xff]   ;;  %v2571_v17 = vmov 0.0  }
  0x37   :  { %698 = vmatprep.mubr.bf16.mxu1 %v1959_v39  ;;  %v2389_v57 = vld [vmem:[#allocation2 + $0x1d8] sm:$0xff]   ;;  %v2392_v60 = vld [vmem:[#allocation2 + $0x150] sm:$0xff]   ;;  %v2396_v0 = vld [vmem:[#allocation2 + $0x148] sm:$0xff]  }
  0x38   :  { %2135 = vmatpush3.bf16.msra.mxu0 %v2358_v18  ;;  %v2390_v58 = vld [vmem:[#allocation2 + $0x118] sm:$0xff]   ;;  %v2393_v61 = vld [vmem:[#allocation2 + $0x1d0] sm:$0xff]   ;;  %v2397_v1 = vld [vmem:[#allocation2 + $0x1c8] sm:$0xff]  }
  0x39   :  { %2157 = vmatpush3.bf16.msra.mxu1 %v2359_v19  ;;  %2136 = vmatprep.subr.bf16.mxu0 %v2360_v20  ;;  %v2391_v59 = vld [vmem:[#allocation2 + $0x198] sm:$0xff]   ;;  %v2394_v62 = vld [vmem:[#allocation2 + $0x110] sm:$0xff]   ;;  %v2398_v2 = vld [vmem:[#allocation2 + $0x108] sm:$0xff]  }
  0x3a   :  { %2158 = vmatprep.subr.bf16.mxu1 %v2361_v21  ;;  %v2395_v63 = vld [vmem:[#allocation2 + $0x190] sm:$0xff]   ;;  %v2399_v3 = vld [vmem:[#allocation2 + $0x188] sm:$0xff]   ;;  %v2400_v4 = vld [vmem:[#allocation2 + $0x140] sm:$0xff]  }
  0x3b   :  { %v2401_v5 = vld [vmem:[#allocation2 + $0x1c0] sm:$0xff]   ;;  %v66_v8 = vld [vmem:[%s2783_s0 + $0x10] sm:$0xff]  ;;  %v67_v12 = vld [vmem:[%s2783_s0 + $0x18] sm:$0xff] }
  0x3c   :  { %2137 = vmatpush3.bf16.msra.mxu0 %v2362_v22  ;;  %v2402_v6 = vld [vmem:[#allocation2 + $0x100] sm:$0xff]   ;;  %v70_v9 = vld [vmem:[%s2783_s0 + $0x30] sm:$0xff]  ;;  %v71_v13 = vld [vmem:[%s2783_s0 + $0x38] sm:$0xff] }
  0x3d   :  { %2159 = vmatpush3.bf16.msra.mxu1 %v2363_v23  ;;  %2138 = vmatprep.subr.bf16.mxu0 %v2364_v24  ;;  %v2403_v7 = vld [vmem:[#allocation2 + $0x180] sm:$0xff]   ;;  %v1960_v10 = vcombine.low %v66_v8, %v70_v9  ;;  %v1961_v11 = vcombine.high %v66_v8, %v70_v9  ;;  %v1962_v14 = vcombine.low %v67_v12, %v71_v13  ;;  %v2404_v16 = vld [vmem:[#allocation4 + $0x38] sm:$0xff]   ;;  %v2405_v18 = vld [vmem:[#allocation4 + $0x30] sm:$0xff]  }
  0x3e   :  { %2160 = vmatprep.subr.bf16.mxu1 %v2365_v25  ;;  %v1963_v15 = vcombine.high %v67_v12, %v71_v13  ;;  %v2406_v19 = vld [vmem:[#allocation4 + $0x28] sm:$0xff]   ;;  %v2407_v20 = vld [vmem:[#allocation4 + $0x20] sm:$0xff]   ;;  %v2408_v21 = vld [vmem:[#allocation4 + $0x18] sm:$0xff]  }
  0x3f   :  { %v2409_v22 = vld [vmem:[#allocation4 + $0x10] sm:$0xff]   ;;  %v2410_v23 = vld [vmem:[#allocation4 + $0x8] sm:$0xff]   ;;  %v2411_v24 = vld [vmem:[#allocation4] sm:$0xff]  }
  0x40   :  { %2139 = vmatpush3.bf16.msra.mxu0 %v2366_v26  ;;  %v2412_v25 = vld [vmem:[#allocation4 + $0x78] sm:$0xff]   ;;  %v2413_v26 = vld [vmem:[#allocation4 + $0x70] sm:$0xff]   ;;  %v200_v37 = vld [vmem:[%s2787_s4] ss:$0 sm:$0xff] }
  0x41   :  { %2161 = vmatpush3.bf16.msra.mxu1 %v2367_v27  ;;  %2140 = vmatprep.subr.bf16.mxu0 %v2368_v28  ;;  %v2414_v27 = vld [vmem:[#allocation4 + $0x68] sm:$0xff]   ;;  %v2415_v28 = vld [vmem:[#allocation4 + $0x60] sm:$0xff]   ;;  %v2424_v9 = vld [vmem:[#allocation4 + $0x98] sm:$0xff]  }
  0x42   :  { %2162 = vmatprep.subr.bf16.mxu1 %v2369_v29  ;;  %v2416_v29 = vld [vmem:[#allocation4 + $0x58] sm:$0xff]   ;;  %v2423_v8 = vld [vmem:[#allocation4 + $0xa0] sm:$0xff]  }
  0x44   :  { %2141 = vmatpush3.bf16.msra.mxu0 %v2370_v30 }
  0x45   :  { %2163 = vmatpush3.bf16.msra.mxu1 %v2371_v31  ;;  %2170 = vmatprep.subr.bf16.mxu0 %v2372_v40 }
  0x46   :  { %2192 = vmatprep.subr.bf16.mxu1 %v2373_v41 }
  0x47   :  { %658 = vmatmul.mubr.bf16.vlgmr.msra.gmra.mxu0 %v1956_v35 }
  0x48   :  { %699 = vmatmul.mubr.bf16.vlgmr.msra.gmra.mxu1 %v1958_v38  ;;  %2171 = vmatpush3.bf16.msra.mxu0 %v2374_v42 }
  0x49   :  { %2193 = vmatpush3.bf16.msra.mxu1 %v2375_v43  ;;  %2172 = vmatprep.subr.bf16.mxu0 %v2376_v44 }
  0x4a   :  { %2194 = vmatprep.subr.bf16.mxu1 %v2377_v45  ;;  %739 = vmatprep.mubr.bf16.mxu0 %v1961_v11 }
  0x4b   :  { %780 = vmatprep.mubr.bf16.mxu1 %v1963_v15 }
  0x4c   :  { %2173 = vmatpush3.bf16.msra.mxu0 %v2378_v46 }
  0x4d   :  { %2195 = vmatpush3.bf16.msra.mxu1 %v2379_v47  ;;  %2174 = vmatprep.subr.bf16.mxu0 %v2380_v48 }
  0x4e   :  { %2196 = vmatprep.subr.bf16.mxu1 %v2381_v49 }
  0x50   :  { %2175 = vmatpush3.bf16.msra.mxu0 %v2382_v50 }
  0x51   :  { %2197 = vmatpush3.bf16.msra.mxu1 %v2383_v51  ;;  %2176 = vmatprep.subr.bf16.mxu0 %v2384_v52 }
  0x52   :  { %2198 = vmatprep.subr.bf16.mxu1 %v2385_v53 }
  0x54   :  { %2177 = vmatpush3.bf16.msra.mxu0 %v2386_v54 }
  0x55   :  { %2199 = vmatpush3.bf16.msra.mxu1 %v2387_v55  ;;  %2178 = vmatprep.subr.bf16.mxu0 %v2388_v56 }
  0x56   :  { %2200 = vmatprep.subr.bf16.mxu1 %v2389_v57 }
  0x58   :  { %2179 = vmatpush3.bf16.msra.mxu0 %v2390_v58 }
  0x59   :  { %2201 = vmatpush3.bf16.msra.mxu1 %v2391_v59  ;;  %2180 = vmatprep.subr.bf16.mxu0 %v2392_v60 }
  0x5a   :  { %2202 = vmatprep.subr.bf16.mxu1 %v2393_v61 }
  0x5c   :  { %2181 = vmatpush3.bf16.msra.mxu0 %v2394_v62 }
  0x5d   :  { %2203 = vmatpush3.bf16.msra.mxu1 %v2395_v63  ;;  %2182 = vmatprep.subr.bf16.mxu0 %v2396_v0 }
  0x5e   :  { %2204 = vmatprep.subr.bf16.mxu1 %v2397_v1 }
  0x60   :  { %2183 = vmatpush3.bf16.msra.mxu0 %v2398_v2  ;;  %v2417_v2 = vld [vmem:[#allocation4 + $0x50] sm:$0xff]  }
  0x61   :  { %2205 = vmatpush3.bf16.msra.mxu1 %v2399_v3  ;;  %2184 = vmatprep.subr.bf16.mxu0 %v2400_v4  ;;  %v2418_v3 = vld [vmem:[#allocation4 + $0x48] sm:$0xff]   ;;  %v2419_v4 = vld [vmem:[#allocation4 + $0x40] sm:$0xff]  }
  0x62   :  { %2206 = vmatprep.subr.bf16.mxu1 %v2401_v5  ;;  %v2420_v5 = vld [vmem:[#allocation4 + $0xb8] sm:$0xff]  }
  0x64   :  { %2185 = vmatpush3.bf16.msra.mxu0 %v2402_v6  ;;  %v2421_v6 = vld [vmem:[#allocation4 + $0xb0] sm:$0xff]  }
  0x65   :  { %2207 = vmatpush3.bf16.msra.mxu1 %v2403_v7  ;;  %2250 = vmatprep.subr.bf16.mxu0 %v2571_v17  ;;  %v2422_v7 = vld [vmem:[#allocation4 + $0xa8] sm:$0xff]  }
  0x66   :  { %2270 = vmatprep.subr.bf16.mxu1 %v2571_v17 }
  0x67   :  { %740 = vmatmul.mubr.bf16.vlgmr.msra.gmra.mxu0 %v1960_v10  ;;  %v807_v10 = vld [vmem:[%s2787_s4 + $0x1] ss:$0 sm:$0xff] }
  0x68   :  { %781 = vmatmul.mubr.bf16.vlgmr.msra.gmra.mxu1 %v1962_v14  ;;  %2251 = vmatpush3.bf16.msra.mxu0 %v2404_v16 }
  0x69   :  { %2252 = vmatprep.subr.bf16.mxu0 %v2571_v17  ;;  %2266 = vmatprep.mubr.msk.bf16.mxu0 %vm2572_vm0, %v2571_v17 }
  0x6a   :  { %2286 = vmatprep.mubr.msk.bf16.mxu1 %vm2572_vm0, %v2571_v17  ;;  %2271 = vmatpush3.bf16.msra.mxu1 %v2412_v25  ;;  %v2429_v25 = vld [vmem:[#allocation4 + $0xf0] sm:$0xff]  }
  0x6b   :  { %2272 = vmatprep.subr.bf16.mxu1 %v2571_v17 }
  0x6c   :  { %2253 = vmatpush3.bf16.msra.mxu0 %v2405_v18 }
  0x6d   :  { %2254 = vmatprep.subr.bf16.mxu0 %v2571_v17 }
  0x6e   :  { %2273 = vmatpush3.bf16.msra.mxu1 %v2413_v26  ;;  %v2430_v26 = vld [vmem:[#allocation4 + $0xe8] sm:$0xff]  }
  0x6f   :  { %2274 = vmatprep.subr.bf16.mxu1 %v2571_v17 }
  0x70   :  { %2255 = vmatpush3.bf16.msra.mxu0 %v2406_v19 }
  0x71   :  { %2256 = vmatprep.subr.bf16.mxu0 %v2571_v17 }
  0x72   :  { %2275 = vmatpush3.bf16.msra.mxu1 %v2414_v27  ;;  %v2431_v27 = vld [vmem:[#allocation4 + $0xe0] sm:$0xff]  }
  0x73   :  { %2276 = vmatprep.subr.bf16.mxu1 %v2571_v17 }
  0x74   :  { %2257 = vmatpush3.bf16.msra.mxu0 %v2407_v20 }
  0x75   :  { %2258 = vmatprep.subr.bf16.mxu0 %v2571_v17 }
  0x76   :  { %2277 = vmatpush3.bf16.msra.mxu1 %v2415_v28  ;;  %v2432_v28 = vld [vmem:[#allocation4 + $0xd8] sm:$0xff]  }
  0x77   :  { %2278 = vmatprep.subr.bf16.mxu1 %v2571_v17 }
  0x78   :  { %2259 = vmatpush3.bf16.msra.mxu0 %v2408_v21  ;;  %v2425_v21 = vld [vmem:[#allocation4 + $0x90] sm:$0xff]  }
  0x79   :  { %2260 = vmatprep.subr.bf16.mxu0 %v2571_v17 }
  0x7a   :  { %2279 = vmatpush3.bf16.msra.mxu1 %v2416_v29  ;;  %v917_v29 = vld [vmem:[%s2787_s4 + $0x2] ss:$0 sm:$0xff] }
  0x7b   :  { %2280 = vmatprep.subr.bf16.mxu1 %v2571_v17 }
  0x7c   :  { %2261 = vmatpush3.bf16.msra.mxu0 %v2409_v22  ;;  %v2426_v22 = vld [vmem:[#allocation4 + $0x88] sm:$0xff]  }
  0x7d   :  { %2262 = vmatprep.subr.bf16.mxu0 %v2571_v17 }
  0x7e   :  { %2281 = vmatpush3.bf16.msra.mxu1 %v2417_v2  ;;  %v1252_v2 = vld [vmem:[#allocation6 + $0xa0] sm:$0xff] }
  0x7f   :  { %2282 = vmatprep.subr.bf16.mxu1 %v2571_v17 }
  0x80   :  { %2263 = vmatpush3.bf16.msra.mxu0 %v2410_v23  ;;  %v2427_v23 = vld [vmem:[#allocation4 + $0x80] sm:$0xff]  }
  0x81   :  { %2264 = vmatprep.subr.bf16.mxu0 %v2571_v17 }
  0x82   :  { %2283 = vmatpush3.bf16.msra.mxu1 %v2418_v3 }
  0x83   :  { %2284 = vmatprep.subr.bf16.mxu1 %v2571_v17 }
  0x84   :  { %2265 = vmatpush3.bf16.msra.mxu0 %v2411_v24  ;;  %v2428_v24 = vld [vmem:[#allocation4 + $0xf8] sm:$0xff]  }
  0x85   :  { %2290 = vmatprep.subr.bf16.mxu0 %v2571_v17 }
  0x86   :  { %2285 = vmatpush3.bf16.msra.mxu1 %v2419_v4 }
  0x87   :  { %2310 = vmatprep.subr.bf16.mxu1 %v2571_v17 }
 0x107   :  { %v2142_v30 = vpop.f32.mrf.mxu0 }
 0x108   :  { %v2164_v31 = vpop.f32.mrf.mxu1 }
 0x109   :  { %v2143_v32 = vpop.f32.mrf.mxu0 }
 0x10a   :  { %v2165_v33 = vpop.f32.mrf.mxu1  ;;  %v2144_v35 = vadd.f32 %v2143_v32, %v2142_v30 }
 0x10b   :  { %v2145_v34 = vpop.f32.mrf.mxu0  ;;  %v2166_v40 = vadd.f32 %v2165_v33, %v2164_v31 }
 0x10c   :  { %v2167_v36 = vpop.f32.mrf.mxu1  ;;  %v660_v39 = vadd.f32 %v2144_v35, %v200_v37 }
 0x10d   :  { %v2146_v38 = vpop.f32.mrf.mxu0 }
 0x10e   :  { %v2147_v41 = vadd.f32 %v2146_v38, %v2145_v34  ;;  %v2168_v42 = vpop.f32.mrf.mxu1  ;;  %v701_v46 = vadd.f32 %v2166_v40, %v660_v39  ;;  %v2433_v39 = vld [vmem:[#allocation4 + $0xd0] sm:$0xff]   ;;  %v2434_v40 = vld [vmem:[#allocation4 + $0xc8] sm:$0xff]  }
 0x10f   :  { %v2169_v51 = vadd.f32 %v2168_v42, %v2167_v36  ;;  %v1288_v42 = vld [vmem:[#allocation6 + $0x1c0] sm:$0xff] }
 0x110   :  { %v663_v47 = vadd.f32 %v2147_v41, %v200_v37  ;;  %v2435_v41 = vld [vmem:[#allocation4 + $0xc0] sm:$0xff]  }
 0x112   :  { %v704_v55 = vadd.f32 %v2169_v51, %v663_v47  ;;  %v1293_v47 = vld [vmem:[#allocation6 + $0x1e8] sm:$0xff] }
 0x127   :  { %v2186_v43 = vpop.f32.mrf.mxu0 }
 0x128   :  { %v2208_v44 = vpop.f32.mrf.mxu1 }
 0x129   :  { %v2187_v45 = vpop.f32.mrf.mxu0 }
 0x12a   :  { %v2188_v48 = vadd.f32 %v2187_v45, %v2186_v43  ;;  %v2209_v49 = vpop.f32.mrf.mxu1  ;;  %v1292_v43 = vld [vmem:[#allocation6 + $0x1e0] sm:$0xff] }
 0x12b   :  { %v2189_v50 = vpop.f32.mrf.mxu0  ;;  %v2210_v56 = vadd.f32 %v2209_v49, %v2208_v44  ;;  %v1289_v44 = vld [vmem:[#allocation6 + $0x1c8] sm:$0xff]  ;;  %v2118_v45 = vcombine.low %v1288_v42, %v1292_v43  ;;  %v1284_v49 = vld [vmem:[#allocation6 + $0x1a0] sm:$0xff] }
 0x12c   :  { %v742_v52 = vadd.f32 %v2188_v48, %v701_v46  ;;  %v2211_v53 = vpop.f32.mrf.mxu1  ;;  %v2119_v46 = vcombine.high %v1288_v42, %v1292_v43  ;;  %v1280_v48 = vld [vmem:[#allocation6 + $0x180] sm:$0xff]  ;;  %v2121_v51 = vcombine.high %v1289_v44, %v1293_v47 }
 0x12d   :  { %v2190_v54 = vpop.f32.mrf.mxu0 }
 0x12e   :  { %v2191_v57 = vadd.f32 %v2190_v54, %v2189_v50  ;;  %v2212_v58 = vpop.f32.mrf.mxu1  ;;  %v783_v59 = vadd.f32 %v2210_v56, %v742_v52  ;;  %v2120_v50 = vcombine.low %v1289_v44, %v1293_v47  ;;  %v2111_v52 = vcombine.high %v1280_v48, %v1284_v49  ;;  %v1272_v54 = vld [vmem:[#allocation6 + $0x140] sm:$0xff] }
 0x12f   :  { %v2213_v61 = vadd.f32 %v2212_v58, %v2211_v53  ;;  %v2110_v53 = vcombine.low %v1280_v48, %v1284_v49  ;;  %v1268_v58 = vld [vmem:[#allocation6 + $0x120] sm:$0xff]  ;;  %v1237_v48 = vld [vmem:[#allocation6 + $0x28] sm:$0xff] }
 0x130   :  { %v745_v60 = vadd.f32 %v2191_v57, %v704_v55  ;;  %v789_v63 = vmax.f32 %v783_v59, 0.0  ;;  %v1264_v57 = vld [vmem:[#allocation6 + $0x100] sm:$0xff] }
 0x131   :  { %v2095_v59 = vcombine.high %v1264_v57, %v1268_v58  ;;  %v1232_v44 = vld [vmem:[#allocation6] sm:$0xff] }
 0x132   :  { %v786_v62 = vadd.f32 %v2213_v61, %v745_v60  ;;  %v2094_v60 = vcombine.low %v1264_v57, %v1268_v58  ;;  %v1256_v61 = vld [vmem:[#allocation6 + $0xc0] sm:$0xff]  ;;  %v2573_v57 = vmov 0  }
 0x134   :  { %v790_v0 = vmax.f32 %v786_v62, 0.0  ;;  %v1260_v62 = vld [vmem:[#allocation6 + $0xe0] sm:$0xff] }
 0x136   :  { %v808_v1 = vpack.c.bf16 %v790_v0, %v789_v63  ;;  %v2087_v63 = vcombine.high %v1256_v61, %v1260_v62  ;;  %v2086_v0 = vcombine.low %v1256_v61, %v1260_v62 }
 0x138   :  { %2267 = vmatmul.mubr.bf16.vlgmr.msra.gmra.mxu0 %v808_v1  ;;  %v1248_v1 = vld [vmem:[#allocation6 + $0x80] sm:$0xff] }
 0x139   :  { %2306 = vmatprep.mubr.msk.bf16.mxu0 %vm2572_vm0, %v2571_v17  ;;  %2291 = vmatpush3.bf16.msra.mxu0 %v2420_v5  ;;  %v2079_v3 = vcombine.high %v1248_v1, %v1252_v2  ;;  %v2078_v4 = vcombine.low %v1248_v1, %v1252_v2  ;;  %v1029_v5 = vld [vmem:[%s2787_s4 + $0x3] ss:$0 sm:$0xff]  ;;  %v1282_v2 = vld [vmem:[#allocation6 + $0x190] sm:$0xff] }
 0x13a   :  { %2292 = vmatprep.subr.bf16.mxu0 %v2571_v17 }
 0x13d   :  { %2293 = vmatpush3.bf16.msra.mxu0 %v2421_v6 }
 0x13e   :  { %2294 = vmatprep.subr.bf16.mxu0 %v2571_v17 }
 0x141   :  { %2295 = vmatpush3.bf16.msra.mxu0 %v2422_v7 }
 0x142   :  { %2296 = vmatprep.subr.bf16.mxu0 %v2571_v17 }
 0x145   :  { %2297 = vmatpush3.bf16.msra.mxu0 %v2423_v8 }
 0x146   :  { %2298 = vmatprep.subr.bf16.mxu0 %v2571_v17 }
 0x149   :  { %2299 = vmatpush3.bf16.msra.mxu0 %v2424_v9 }
 0x14a   :  { %2300 = vmatprep.subr.bf16.mxu0 %v2571_v17 }
 0x14d   :  { %2301 = vmatpush3.bf16.msra.mxu0 %v2425_v21 }
 0x14e   :  { %2302 = vmatprep.subr.bf16.mxu0 %v2571_v17 }
 0x151   :  { %2303 = vmatpush3.bf16.msra.mxu0 %v2426_v22 }
 0x152   :  { %2304 = vmatprep.subr.bf16.mxu0 %v2571_v17 }
 0x155   :  { %2305 = vmatpush3.bf16.msra.mxu0 %v2427_v23  ;;  %v1265_v23 = vld [vmem:[#allocation6 + $0x108] sm:$0xff] }
 0x156   :  { %1662 = vmatprep.subr.bf16.mxu0 %v2119_v46  ;;  %v1233_v46 = vld [vmem:[#allocation6 + $0x8] sm:$0xff] }
 0x1f8   :  { %v891_v11 = vpop.f32.mrf.mxu0 }
 0x1f9   :  { %v892_v13 = vadd.f32 %v891_v11, %v807_v10 }
 0x1fa   :  { %v2268_v12 = vpop.f32.mrf.mxu0 }
 0x1fb   :  { %v898_v18 = vmax.f32 %v892_v13, 0.0  ;;  %v1281_v12 = vld [vmem:[#allocation6 + $0x188] sm:$0xff] }
 0x1fc   :  { %v894_v14 = vpop.f32.mrf.mxu0  ;;  %v1285_v13 = vld [vmem:[#allocation6 + $0x1a8] sm:$0xff] }
 0x1fd   :  { %v895_v15 = vadd.f32 %v894_v14, %v807_v10  ;;  %v2112_v21 = vcombine.low %v1281_v12, %v1285_v13 }
 0x1fe   :  { %v2269_v16 = vpop.f32.mrf.mxu0 }
 0x1ff   :  { %v899_v19 = vmax.f32 %v895_v15, 0.0 }
 0x201   :  { %v918_v20 = vpack.c.bf16 %v899_v19, %v898_v18  ;;  %v2113_v18 = vcombine.high %v1281_v12, %v1285_v13  ;;  %v1273_v19 = vld [vmem:[#allocation6 + $0x148] sm:$0xff]  ;;  %v1274_v12 = vld [vmem:[#allocation6 + $0x150] sm:$0xff] }
 0x202   :  { %v1278_v13 = vld [vmem:[#allocation6 + $0x170] sm:$0xff] }
 0x203   :  { %2287 = vmatmul.mubr.bf16.vlgmr.msra.gmra.mxu1 %v918_v20  ;;  %v1277_v20 = vld [vmem:[#allocation6 + $0x168] sm:$0xff] }
 0x204   :  { %2326 = vmatprep.mubr.msk.bf16.mxu1 %vm2572_vm0, %v2571_v17  ;;  %2311 = vmatpush3.bf16.msra.mxu1 %v2428_v24  ;;  %v2105_v22 = vcombine.high %v1273_v19, %v1277_v20  ;;  %v1269_v24 = vld [vmem:[#allocation6 + $0x128] sm:$0xff] }
 0x205   :  { %2312 = vmatprep.subr.bf16.mxu1 %v2571_v17 }
 0x208   :  { %2313 = vmatpush3.bf16.msra.mxu1 %v2429_v25  ;;  %v2104_v25 = vcombine.low %v1273_v19, %v1277_v20  ;;  %v2107_v19 = vcombine.high %v1274_v12, %v1278_v13 }
 0x209   :  { %2314 = vmatprep.subr.bf16.mxu1 %v2571_v17 }
 0x20c   :  { %2315 = vmatpush3.bf16.msra.mxu1 %v2430_v26  ;;  %v2097_v26 = vcombine.high %v1265_v23, %v1269_v24 }
 0x20d   :  { %2316 = vmatprep.subr.bf16.mxu1 %v2571_v17 }
 0x210   :  { %2317 = vmatpush3.bf16.msra.mxu1 %v2431_v27  ;;  %v1257_v27 = vld [vmem:[#allocation6 + $0xc8] sm:$0xff] }
 0x211   :  { %2318 = vmatprep.subr.bf16.mxu1 %v2571_v17 }
 0x214   :  { %2319 = vmatpush3.bf16.msra.mxu1 %v2432_v28  ;;  %v1261_v28 = vld [vmem:[#allocation6 + $0xe8] sm:$0xff] }
 0x215   :  { %2320 = vmatprep.subr.bf16.mxu1 %v2571_v17 }
 0x218   :  { %2321 = vmatpush3.bf16.msra.mxu1 %v2433_v39 }
 0x219   :  { %2322 = vmatprep.subr.bf16.mxu1 %v2571_v17 }
 0x21c   :  { %2323 = vmatpush3.bf16.msra.mxu1 %v2434_v40  ;;  %v1245_v40 = vld [vmem:[#allocation6 + $0x68] sm:$0xff] }
 0x21d   :  { %2324 = vmatprep.subr.bf16.mxu1 %v2571_v17  ;;  %v1276_v17 = vld [vmem:[#allocation6 + $0x160] sm:$0xff] }
 0x21e   :  { %v2103_v55 = vcombine.high %v1272_v54, %v1276_v17  ;;  %v2102_v56 = vcombine.low %v1272_v54, %v1276_v17  ;;  %v1291_v54 = vld [vmem:[#allocation6 + $0x1d8] sm:$0xff] }
 0x220   :  { %2325 = vmatpush3.bf16.msra.mxu1 %v2435_v41 }
 0x221   :  { %1705 = vmatprep.subr.bf16.mxu1 %v2121_v51  ;;  %v2065_v51 = vcombine.high %v1233_v46, %v1237_v48 }
 0x2c3   :  { %v1001_v30 = vpop.f32.mrf.mxu1 }
 0x2c4   :  { %v1002_v31 = vadd.f32 %v1001_v30, %v917_v29  ;;  %v2089_v30 = vcombine.high %v1257_v27, %v1261_v28 }
 0x2c5   :  { %v2288_v32 = vpop.f32.mrf.mxu1 }
 0x2c6   :  { %v1008_v33 = vmax.f32 %v1002_v31, 0.0  ;;  %v1249_v31 = vld [vmem:[#allocation6 + $0x88] sm:$0xff] }
 0x2c7   :  { %v1004_v34 = vpop.f32.mrf.mxu1  ;;  %v1253_v32 = vld [vmem:[#allocation6 + $0xa8] sm:$0xff] }
 0x2c8   :  { %1010 = vst [vmem:[%s2788_s5] sm:$0xff] %v1008_v33  ;;  %v1005_v35 = vadd.f32 %v1004_v34, %v917_v29  ;;  %v2096_v29 = vcombine.low %v1265_v23, %v1269_v24  ;;  %v2081_v34 = vcombine.high %v1249_v31, %v1253_v32  ;;  %v1267_v23 = vld [vmem:[#allocation6 + $0x118] sm:$0xff] }
 0x2c9   :  { %v2289_v36 = vpop.f32.mrf.mxu1  ;;  %v1271_v24 = vld [vmem:[#allocation6 + $0x138] sm:$0xff] }
 0x2ca   :  { %v1009_v37 = vmax.f32 %v1005_v35, 0.0  ;;  %v2080_v35 = vcombine.low %v1249_v31, %v1253_v32  ;;  %v1240_v36 = vld [vmem:[#allocation6 + $0x40] sm:$0xff]  ;;  %v1259_v31 = vld [vmem:[#allocation6 + $0xd8] sm:$0xff] }
 0x2cb   :  { %v1263_v32 = vld [vmem:[#allocation6 + $0xf8] sm:$0xff] }
 0x2cc   :  { %1011 = vst [vmem:[%s2788_s5 + $0x8] sm:$0xff] %v1009_v37  ;;  %v1030_v38 = vpack.c.bf16 %v1009_v37, %v1008_v33  ;;  %v2088_v33 = vcombine.low %v1257_v27, %v1261_v28  ;;  %v1244_v37 = vld [vmem:[#allocation6 + $0x60] sm:$0xff]  ;;  %v2101_v28 = vcombine.high %v1267_v23, %v1271_v24 }
 0x2cd   :  { %v2071_v39 = vcombine.high %v1240_v36, %v1244_v37  ;;  %v2070_v41 = vcombine.low %v1240_v36, %v1244_v37  ;;  %v2093_v36 = vcombine.high %v1259_v31, %v1263_v32  ;;  %v1250_v37 = vld [vmem:[#allocation6 + $0x90] sm:$0xff] }
 0x2ce   :  { %2307 = vmatmul.mubr.bf16.vlgmr.msra.gmra.mxu0 %v1030_v38  ;;  %v1241_v38 = vld [vmem:[#allocation6 + $0x48] sm:$0xff] }
 0x2cf   :  { %1663 = vmatpush1.bf16.msra.mxu0 %v2118_v45  ;;  %v2072_v42 = vcombine.low %v1241_v38, %v1245_v40  ;;  %v2073_v43 = vcombine.high %v1241_v38, %v1245_v40  ;;  %v1236_v45 = vld [vmem:[#allocation6 + $0x20] sm:$0xff]  ;;  %1694 = vmatprep.mubr.bf16.mxu0 %v2573_v57  ;;  %v1254_v38 = vld [vmem:[#allocation6 + $0xb0] sm:$0xff]  ;;  %v1255_v40 = vld [vmem:[#allocation6 + $0xb8] sm:$0xff] }
 0x2d0   :  { %1664 = vmatprep.subr.bf16.mxu0 %v2111_v52  ;;  %v2063_v47 = vcombine.high %v1232_v44, %v1236_v45  ;;  %v2062_v49 = vcombine.low %v1232_v44, %v1236_v45  ;;  %v1290_v52 = vld [vmem:[#allocation6 + $0x1d0] sm:$0xff] }
 0x2d1   :  { %v1242_v45 = vld [vmem:[#allocation6 + $0x50] sm:$0xff] }
 0x2d3   :  { %1665 = vmatpush1.bf16.msra.mxu0 %v2110_v53  ;;  %v1294_v53 = vld [vmem:[#allocation6 + $0x1f0] sm:$0xff] }
 0x2d4   :  { %1666 = vmatprep.subr.bf16.mxu0 %v2103_v55  ;;  %v2122_v17 = vcombine.low %v1290_v52, %v1294_v53  ;;  %v2123_v55 = vcombine.high %v1290_v52, %v1294_v53  ;;  %v1234_v53 = vld [vmem:[#allocation6 + $0x10] sm:$0xff] }
 0x2d7   :  { %1667 = vmatpush1.bf16.msra.mxu0 %v2102_v56  ;;  %v1295_v56 = vld [vmem:[#allocation6 + $0x1f8] sm:$0xff] }
 0x2d8   :  { %1668 = vmatprep.subr.bf16.mxu0 %v2095_v59  ;;  %v2124_v58 = vcombine.low %v1291_v54, %v1295_v56  ;;  %v2125_v59 = vcombine.high %v1291_v54, %v1295_v56  ;;  %v1238_v54 = vld [vmem:[#allocation6 + $0x30] sm:$0xff] }
 0x2db   :  { %1669 = vmatpush1.bf16.msra.mxu0 %v2094_v60  ;;  %v1139_v60 = vld [vmem:[%s2787_s4 + $0x4] ss:$0 sm:$0xff] }
 0x2dc   :  { %1670 = vmatprep.subr.bf16.mxu0 %v2087_v63 }
 0x2df   :  { %1671 = vmatpush1.bf16.msra.mxu0 %v2086_v0 }
 0x2e0   :  { %1672 = vmatprep.subr.bf16.mxu0 %v2079_v3 }
 0x2e3   :  { %1673 = vmatpush1.bf16.msra.mxu0 %v2078_v4  ;;  %v1286_v4 = vld [vmem:[#allocation6 + $0x1b0] sm:$0xff] }
 0x2e4   :  { %1674 = vmatprep.subr.bf16.mxu0 %v2071_v39  ;;  %v1251_v39 = vld [vmem:[#allocation6 + $0x98] sm:$0xff] }
 0x2e5   :  { %v2085_v44 = vcombine.high %v1251_v39, %v1255_v40 }
 0x2e7   :  { %1675 = vmatpush1.bf16.msra.mxu0 %v2070_v41 }
 0x2e8   :  { %1676 = vmatprep.subr.bf16.mxu0 %v2063_v47  ;;  %v1243_v47 = vld [vmem:[#allocation6 + $0x58] sm:$0xff] }
 0x2eb   :  { %1677 = vmatpush1.bf16.msra.mxu0 %v2062_v49  ;;  %v2082_v49 = vcombine.low %v1250_v37, %v1254_v38 }
 0x2ec   :  { %1748 = vmatprep.subr.bf16.mxu0 %v2123_v55  ;;  %v1239_v55 = vld [vmem:[#allocation6 + $0x38] sm:$0xff] }
 0x38e   :  { %v1113_v6 = vpop.f32.mrf.mxu0 }
 0x38f   :  { %v1114_v8 = vadd.f32 %v1113_v6, %v1029_v5  ;;  %v1287_v6 = vld [vmem:[#allocation6 + $0x1b8] sm:$0xff] }
 0x390   :  { %v2308_v7 = vpop.f32.mrf.mxu0 }
 0x391   :  { %v1120_v14 = vmax.f32 %v1114_v8, 0.0 }
 0x392   :  { %v1116_v9 = vpop.f32.mrf.mxu0 }
 0x393   :  { %v1117_v10 = vadd.f32 %v1116_v9, %v1029_v5  ;;  %v1283_v5 = vld [vmem:[#allocation6 + $0x198] sm:$0xff] }
 0x394   :  { %v2309_v11 = vpop.f32.mrf.mxu0 }
 0x395   :  { %v1121_v15 = vmax.f32 %v1117_v10, 0.0  ;;  %v2115_v10 = vcombine.high %v1282_v2, %v1286_v4  ;;  %v2117_v11 = vcombine.high %v1283_v5, %v1287_v6 }
 0x397   :  { %v1140_v16 = vpack.c.bf16 %v1121_v15, %v1120_v14  ;;  %v1275_v14 = vld [vmem:[#allocation6 + $0x158] sm:$0xff] }
 0x398   :  { %v1279_v15 = vld [vmem:[#allocation6 + $0x178] sm:$0xff] }
 0x399   :  { %2327 = vmatmul.mubr.bf16.vlgmr.msra.gmra.mxu1 %v1140_v16  ;;  %v2114_v16 = vcombine.low %v1282_v2, %v1286_v4  ;;  %v2109_v20 = vcombine.high %v1275_v14, %v1279_v15 }
 0x39a   :  { %1706 = vmatpush1.bf16.msra.mxu1 %v2120_v50  ;;  %v2064_v50 = vcombine.low %v1233_v46, %v1237_v48  ;;  %1737 = vmatprep.mubr.bf16.mxu1 %v2573_v57  ;;  %v1246_v46 = vld [vmem:[#allocation6 + $0x70] sm:$0xff]  ;;  %v1247_v48 = vld [vmem:[#allocation6 + $0x78] sm:$0xff] }
 0x39b   :  { %1707 = vmatprep.subr.bf16.mxu1 %v2113_v18  ;;  %v2116_v18 = vcombine.low %v1283_v5, %v1287_v6  ;;  %v2077_v52 = vcombine.high %v1243_v47, %v1247_v48  ;;  %v2074_v56 = vcombine.low %v1242_v45, %v1246_v46 }
 0x39e   :  { %1708 = vmatpush1.bf16.msra.mxu1 %v2112_v21  ;;  %v1266_v21 = vld [vmem:[#allocation6 + $0x110] sm:$0xff] }
 0x39f   :  { %1709 = vmatprep.subr.bf16.mxu1 %v2105_v22  ;;  %v1270_v22 = vld [vmem:[#allocation6 + $0x130] sm:$0xff] }
 0x3a0   :  { %v2099_v27 = vcombine.high %v1266_v21, %v1270_v22 }
 0x3a2   :  { %1710 = vmatpush1.bf16.msra.mxu1 %v2104_v25  ;;  %v2106_v25 = vcombine.low %v1274_v12, %v1278_v13 }
 0x3a3   :  { %1711 = vmatprep.subr.bf16.mxu1 %v2097_v26  ;;  %v2108_v26 = vcombine.low %v1275_v14, %v1279_v15 }
 0x3a6   :  { %1712 = vmatpush1.bf16.msra.mxu1 %v2096_v29  ;;  %v1258_v29 = vld [vmem:[#allocation6 + $0xd0] sm:$0xff] }
 0x3a7   :  { %1713 = vmatprep.subr.bf16.mxu1 %v2089_v30  ;;  %v1262_v30 = vld [vmem:[#allocation6 + $0xf0] sm:$0xff] }
 0x3a8   :  { %v2090_v41 = vcombine.low %v1258_v29, %v1262_v30 }
 0x3aa   :  { %1714 = vmatpush1.bf16.msra.mxu1 %v2088_v33  ;;  %v2098_v33 = vcombine.low %v1266_v21, %v1270_v22 }
 0x3ab   :  { %1715 = vmatprep.subr.bf16.mxu1 %v2081_v34  ;;  %v2100_v34 = vcombine.low %v1267_v23, %v1271_v24 }
 0x3ae   :  { %1716 = vmatpush1.bf16.msra.mxu1 %v2080_v35  ;;  %v2091_v35 = vcombine.high %v1258_v29, %v1262_v30 }
 0x3af   :  { %1717 = vmatprep.subr.bf16.mxu1 %v2073_v43  ;;  %v2083_v43 = vcombine.high %v1250_v37, %v1254_v38 }
 0x3b2   :  { %1718 = vmatpush1.bf16.msra.mxu1 %v2072_v42  ;;  %v2092_v42 = vcombine.low %v1259_v31, %v1263_v32 }
 0x3b3   :  { %1719 = vmatprep.subr.bf16.mxu1 %v2065_v51  ;;  %v2075_v51 = vcombine.high %v1242_v45, %v1246_v46 }
 0x3b6   :  { %1720 = vmatpush1.bf16.msra.mxu1 %v2064_v50  ;;  %v2084_v50 = vcombine.low %v1251_v39, %v1255_v40 }
 0x3b7   :  { %1791 = vmatprep.subr.bf16.mxu1 %v2125_v59 }
 0x459   :  { %v1223_v61 = vpop.f32.mrf.mxu1 }
 0x45a   :  { %v1224_v63 = vadd.f32 %v1223_v61, %v1139_v60 }
 0x45b   :  { %v2328_v62 = vpop.f32.mrf.mxu1 }
 0x45c   :  { %v1230_v7 = vmax.f32 %v1224_v63, 0.0  ;;  %v1302_v62 = vlaneseq }
 0x45d   :  { %v1226_v0 = vpop.f32.mrf.mxu1 }
 0x45e   :  { %v1227_v1 = vadd.f32 %v1226_v0, %v1139_v60  ;;  %v2066_v60 = vcombine.low %v1234_v53, %v1238_v54  ;;  %v2709_v63 = vshrl.u32 %v1302_v62, 7  ;;  %v2060_v0 = vld [vmem:[%s2787_s4 + $0x5] ss:$8 sm:$0xf] }
 0x45f   :  { %v2329_v3 = vpop.f32.mrf.mxu1 }
 0x460   :  { %v1231_v8 = vmax.f32 %v1227_v1, 0.0  ;;  %v2061_v1 = vld [vmem:[%s2787_s4 + $0x5] ss:$8 sm:$0xf0]  ;;  %v1304_v3 = vsub.s32 0, %v2709_v63  ;;  %v1312_v4 = vsub.s32 2, %v2709_v63 }
 0x461   :  { %v2717_v2 = vor.u32 %v2061_v1, %v2060_v0  ;;  %v1308_v5 = vsub.s32 1, %v2709_v63  ;;  %v1316_v6 = vsub.s32 3, %v2709_v63  ;;  %v1324_v62 = vsub.s32 5, %v2709_v63 }
 0x462   :  { %v2703_v9 = vpack.c.bf16 %v1231_v8, %v1230_v7  ;;  %v1332_v0 = vsub.s32 7, %v2709_v63 }
 0x463   :  { %v1305_v7 = vrot.slane %v2717_v2, %v1304_v3  ;;  %v1313_v8 = vrot.slane %v2717_v2, %v1312_v4 }
 0x464   :  { %1695 = vmatmul.mubr.bf16.vlgmr.msra.gmra.mxu0 %v2703_v9  ;;  %1738 = vmatmul.mubr.bf16.vlgmr.msra.gmra.mxu1 %v2703_v9 }
 0x465   :  { %1749 = vmatpush1.bf16.msra.mxu0 %v2122_v17  ;;  %1792 = vmatpush1.bf16.msra.mxu1 %v2124_v58  ;;  %v1235_v17 = vld [vmem:[#allocation6 + $0x18] sm:$0xff]  ;;  %v2067_v58 = vcombine.high %v1234_v53, %v1238_v54 }
 0x466   :  { %1750 = vmatprep.subr.bf16.mxu0 %v2115_v10  ;;  %1793 = vmatprep.subr.bf16.mxu1 %v2117_v11  ;;  %v2069_v59 = vcombine.high %v1235_v17, %v1239_v55  ;;  %v2068_v61 = vcombine.low %v1235_v17, %v1239_v55  ;;  %v1317_v10 = vrot.slane %v2717_v2, %v1316_v6 }
 0x467   :  { %1780 = vmatprep.mubr.bf16.mxu0 %v2573_v57  ;;  %1823 = vmatprep.mubr.bf16.mxu1 %v2573_v57  ;;  %v2076_v57 = vcombine.low %v1243_v47, %v1247_v48 }
 0x469   :  { %1751 = vmatpush1.bf16.msra.mxu0 %v2114_v16  ;;  %1794 = vmatpush1.bf16.msra.mxu1 %v2116_v18 }
 0x46a   :  { %1752 = vmatprep.subr.bf16.mxu0 %v2107_v19  ;;  %1795 = vmatprep.subr.bf16.mxu1 %v2109_v20 }
 0x46d   :  { %1753 = vmatpush1.bf16.msra.mxu0 %v2106_v25  ;;  %1796 = vmatpush1.bf16.msra.mxu1 %v2108_v26 }
 0x46e   :  { %1754 = vmatprep.subr.bf16.mxu0 %v2099_v27  ;;  %1797 = vmatprep.subr.bf16.mxu1 %v2101_v28 }
 0x471   :  { %1755 = vmatpush1.bf16.msra.mxu0 %v2098_v33  ;;  %1798 = vmatpush1.bf16.msra.mxu1 %v2100_v34 }
 0x472   :  { %1756 = vmatprep.subr.bf16.mxu0 %v2091_v35  ;;  %1799 = vmatprep.subr.bf16.mxu1 %v2093_v36 }
 0x475   :  { %1757 = vmatpush1.bf16.msra.mxu0 %v2090_v41  ;;  %1800 = vmatpush1.bf16.msra.mxu1 %v2092_v42 }
 0x476   :  { %1758 = vmatprep.subr.bf16.mxu0 %v2083_v43  ;;  %1801 = vmatprep.subr.bf16.mxu1 %v2085_v44 }
 0x479   :  { %1759 = vmatpush1.bf16.msra.mxu0 %v2082_v49  ;;  %1802 = vmatpush1.bf16.msra.mxu1 %v2084_v50 }
 0x47a   :  { %1760 = vmatprep.subr.bf16.mxu0 %v2075_v51  ;;  %1803 = vmatprep.subr.bf16.mxu1 %v2077_v52 }
 0x47d   :  { %1761 = vmatpush1.bf16.msra.mxu0 %v2074_v56  ;;  %1804 = vmatpush1.bf16.msra.mxu1 %v2076_v57 }
 0x47e   :  { %1762 = vmatprep.subr.bf16.mxu0 %v2067_v58  ;;  %1805 = vmatprep.subr.bf16.mxu1 %v2069_v59  ;;  %v1320_v58 = vsub.s32 4, %v2709_v63  ;;  %v1328_v59 = vsub.s32 6, %v2709_v63 }
 0x480   :  { %v1321_v6 = vrot.slane %v2717_v2, %v1320_v58 }
 0x481   :  { %1763 = vmatpush1.bf16.msra.mxu0 %v2066_v60  ;;  %1806 = vmatpush1.bf16.msra.mxu1 %v2068_v61 }
 0x484   :  { %1781 = vmatmul.mubr.bf16.vlgmr.msra.gmra.mxu0 %v2703_v9  ;;  %1824 = vmatmul.mubr.bf16.vlgmr.msra.gmra.mxu1 %v2703_v9  ;;  %v1309_v9 = vrot.slane %v2717_v2, %v1308_v5 }
 0x524   :  { %v1696_v11 = vpop.f32.mrf.mxu0  ;;  %v1739_v12 = vpop.f32.mrf.mxu1 }
 0x525   :  { %v1697_v13 = vadd.f32 %v1696_v11, %v1305_v7  ;;  %v1740_v14 = vadd.f32 %v1739_v12, %v1313_v8  ;;  %v1325_v11 = vrot.slane %v2717_v2, %v1324_v62  ;;  %v1333_v12 = vrot.slane %v2717_v2, %v1332_v0 }
 0x526   :  { %v1698_v15 = vpop.f32.mrf.mxu0  ;;  %v1741_v16 = vpop.f32.mrf.mxu1 }
 0x527   :  { %v1834_v18 = vmax.f32 %v1697_v13, -60.0  ;;  %v1836_v19 = vmax.f32 %v1740_v14, -60.0  ;;  %v1699_v20 = vadd.f32 %v1698_v15, %v1309_v9  ;;  %v1742_v21 = vadd.f32 %v1741_v16, %v1317_v10 }
 0x528   :  { %v1700_v22 = vpop.f32.mrf.mxu0  ;;  %v1743_v23 = vpop.f32.mrf.mxu1 }
 0x529   :  { %v1850_v24 = vsub.f32 0.0, %v1834_v18  ;;  %v1852_v25 = vsub.f32 0.0, %v1836_v19  ;;  %v1835_v26 = vmax.f32 %v1699_v20, -60.0  ;;  %v1837_v27 = vmax.f32 %v1742_v21, -60.0 }
 0x52a   :  { %v1701_v28 = vadd.f32 %v1700_v22, %v1305_v7  ;;  %v1744_v29 = vadd.f32 %v1743_v23, %v1313_v8  ;;  %v1702_v30 = vpop.f32.mrf.mxu0  ;;  %v1745_v31 = vpop.f32.mrf.mxu1  ;;  %v1329_v7 = vrot.slane %v2717_v2, %v1328_v59 }
 0x52b   :  { %v1866_v32 = vmul.f32 1.442695, %v1850_v24  ;;  %v1870_v33 = vmul.f32 1.442695, %v1852_v25  ;;  %v1851_v34 = vsub.f32 0.0, %v1835_v26  ;;  %v1853_v35 = vsub.f32 0.0, %v1837_v27 }
 0x52c   :  { %v1842_v36 = vmax.f32 %v1701_v28, -60.0  ;;  %v1844_v37 = vmax.f32 %v1744_v29, -60.0  ;;  %v1703_v38 = vadd.f32 %v1702_v30, %v1309_v9  ;;  %v1746_v39 = vadd.f32 %v1745_v31, %v1317_v10 }
 0x52d   :  { %2436 = vpow2.f32 %v1866_v32  ;;  %v1868_v40 = vmul.f32 1.442695, %v1851_v34  ;;  %v1872_v41 = vmul.f32 1.442695, %v1853_v35 }
 0x52e   :  { %2438 = vpow2.f32 %v1870_v33  ;;  %v1858_v42 = vsub.f32 0.0, %v1842_v36  ;;  %v1860_v43 = vsub.f32 0.0, %v1844_v37  ;;  %v1843_v44 = vmax.f32 %v1703_v38, -60.0 }
 0x52f   :  { %2440 = vpow2.f32 %v1868_v40  ;;  %v1845_v45 = vmax.f32 %v1746_v39, -60.0 }
 0x530   :  { %2442 = vpow2.f32 %v1872_v41  ;;  %v1882_v46 = vmul.f32 1.442695, %v1858_v42  ;;  %v1886_v47 = vmul.f32 1.442695, %v1860_v43  ;;  %v1859_v48 = vsub.f32 0.0, %v1843_v44 }
 0x531   :  { %v1861_v49 = vsub.f32 0.0, %v1845_v45 }
 0x532   :  { %2444 = vpow2.f32 %v1882_v46  ;;  %v1884_v50 = vmul.f32 1.442695, %v1859_v48 }
 0x533   :  { %2446 = vpow2.f32 %v1886_v47  ;;  %v1888_v51 = vmul.f32 1.442695, %v1861_v49 }
 0x534   :  { %2448 = vpow2.f32 %v1884_v50 }
 0x535   :  { %2450 = vpow2.f32 %v1888_v51 }
 0x53a   :  { %v2437_v52 = vpop.eup %2436 }
 0x53b   :  { %v2439_v53 = vpop.eup %2438  ;;  %v1898_v54 = vadd.f32 1.0, %v2437_v52 }
 0x53c   :  { %v2441_v17 = vpop.eup %2440  ;;  %v1900_v55 = vadd.f32 1.0, %v2439_v53 }
 0x53d   :  { %v2443_v56 = vpop.eup %2442  ;;  %2452 = vrcp.f32 %v1898_v54  ;;  %v1899_v57 = vadd.f32 1.0, %v2441_v17 }
 0x53e   :  { %2454 = vrcp.f32 %v1900_v55  ;;  %v1901_v60 = vadd.f32 1.0, %v2443_v56 }
 0x53f   :  { %v2445_v61 = vpop.eup %2444  ;;  %2456 = vrcp.f32 %v1899_v57 }
 0x540   :  { %v2447_v1 = vpop.eup %2446  ;;  %2458 = vrcp.f32 %v1901_v60  ;;  %v1906_v3 = vadd.f32 1.0, %v2445_v61 }
 0x541   :  { %v2449_v4 = vpop.eup %2448  ;;  %v1908_v5 = vadd.f32 1.0, %v2447_v1 }
 0x542   :  { %v2451_v8 = vpop.eup %2450  ;;  %2460 = vrcp.f32 %v1906_v3  ;;  %v1907_v9 = vadd.f32 1.0, %v2449_v4 }
 0x543   :  { %2462 = vrcp.f32 %v1908_v5  ;;  %v1909_v10 = vadd.f32 1.0, %v2451_v8 }
 0x544   :  { %2464 = vrcp.f32 %v1907_v9  ;;  %v1782_v63 = vpop.f32.mrf.mxu0  ;;  %v1825_v13 = vpop.f32.mrf.mxu1 }
 0x545   :  { %2466 = vrcp.f32 %v1909_v10  ;;  %v1783_v14 = vadd.f32 %v1782_v63, %v1321_v6  ;;  %v1826_v15 = vadd.f32 %v1825_v13, %v1329_v7 }
 0x546   :  { %v1784_v16 = vpop.f32.mrf.mxu0  ;;  %v1827_v18 = vpop.f32.mrf.mxu1 }
 0x547   :  { %v1838_v19 = vmax.f32 %v1783_v14, -60.0  ;;  %v1840_v20 = vmax.f32 %v1826_v15, -60.0  ;;  %v1785_v21 = vadd.f32 %v1784_v16, %v1325_v11  ;;  %v1828_v22 = vadd.f32 %v1827_v18, %v1333_v12 }
 0x548   :  { %v1786_v23 = vpop.f32.mrf.mxu0  ;;  %v1829_v24 = vpop.f32.mrf.mxu1 }
 0x549   :  { %v1854_v25 = vsub.f32 0.0, %v1838_v19  ;;  %v1856_v26 = vsub.f32 0.0, %v1840_v20  ;;  %v1839_v27 = vmax.f32 %v1785_v21, -60.0  ;;  %v1841_v28 = vmax.f32 %v1828_v22, -60.0 }
 0x54a   :  { %v2453_v29 = vpop.eup %2452  ;;  %v1787_v2 = vadd.f32 %v1786_v23, %v1321_v6  ;;  %v1830_v30 = vadd.f32 %v1829_v24, %v1329_v7  ;;  %v1788_v31 = vpop.f32.mrf.mxu0 }
 0x54b   :  { %v1831_v32 = vpop.f32.mrf.mxu1  ;;  %v2455_v33 = vpop.eup %2454  ;;  %1930 = vst [vmem:[%s2789_s6] sm:$0xff] %v2453_v29  ;;  %v1874_v34 = vmul.f32 1.442695, %v1854_v25  ;;  %v1878_v35 = vmul.f32 1.442695, %v1856_v26  ;;  %v1855_v36 = vsub.f32 0.0, %v1839_v27  ;;  %v1857_v37 = vsub.f32 0.0, %v1841_v28 }
 0x54c   :  { %v2457_v38 = vpop.eup %2456  ;;  %1932 = vst [vmem:[%s2789_s6 + $0x10] sm:$0xff] %v2455_v33  ;;  %v1846_v39 = vmax.f32 %v1787_v2, -60.0  ;;  %v1848_v40 = vmax.f32 %v1830_v30, -60.0  ;;  %v1789_v41 = vadd.f32 %v1788_v31, %v1325_v11  ;;  %v1832_v42 = vadd.f32 %v1831_v32, %v1333_v12 }
 0x54d   :  { %v2459_v43 = vpop.eup %2458  ;;  %1931 = vst [vmem:[%s2789_s6 + $0x8] sm:$0xff] %v2457_v38  ;;  %2468 = vpow2.f32 %v1874_v34  ;;  %v1876_v44 = vmul.f32 1.442695, %v1855_v36  ;;  %v1880_v45 = vmul.f32 1.442695, %v1857_v37 }
 0x54e   :  { %1933 = vst [vmem:[%s2789_s6 + $0x18] sm:$0xff] %v2459_v43  ;;  %2470 = vpow2.f32 %v1878_v35  ;;  %v1862_v46 = vsub.f32 0.0, %v1846_v39  ;;  %v1864_v47 = vsub.f32 0.0, %v1848_v40  ;;  %v1847_v48 = vmax.f32 %v1789_v41, -60.0 }
 0x54f   :  { %v2461_v49 = vpop.eup %2460  ;;  %2472 = vpow2.f32 %v1876_v44  ;;  %v1849_v50 = vmax.f32 %v1832_v42, -60.0 }
 0x550   :  { %v2463_v51 = vpop.eup %2462  ;;  %1938 = vst [vmem:[%s2789_s6 + $0x40] sm:$0xff] %v2461_v49  ;;  %2474 = vpow2.f32 %v1880_v45  ;;  %v1890_v52 = vmul.f32 1.442695, %v1862_v46  ;;  %v1894_v53 = vmul.f32 1.442695, %v1864_v47  ;;  %v1863_v54 = vsub.f32 0.0, %v1847_v48 }
 0x551   :  { %v2465_v17 = vpop.eup %2464  ;;  %1940 = vst [vmem:[%s2789_s6 + $0x50] sm:$0xff] %v2463_v51  ;;  %v1865_v55 = vsub.f32 0.0, %v1849_v50 }
 0x552   :  { %v2467_v56 = vpop.eup %2466  ;;  %1939 = vst [vmem:[%s2789_s6 + $0x48] sm:$0xff] %v2465_v17  ;;  %2476 = vpow2.f32 %v1890_v52  ;;  %v1892_v57 = vmul.f32 1.442695, %v1863_v54 }
 0x553   :  { %1941 = vst [vmem:[%s2789_s6 + $0x58] sm:$0xff] %v2467_v56  ;;  %2478 = vpow2.f32 %v1894_v53  ;;  %v1896_v58 = vmul.f32 1.442695, %v1865_v55 }
 0x554   :  { %2480 = vpow2.f32 %v1892_v57 }
 0x555   :  { %2482 = vpow2.f32 %v1896_v58 }
 0x55a   :  { %v2469_v59 = vpop.eup %2468 }
 0x55b   :  { %v2471_v60 = vpop.eup %2470  ;;  %v1902_v61 = vadd.f32 1.0, %v2469_v59 }
 0x55c   :  { %v2473_v62 = vpop.eup %2472  ;;  %v1904_v0 = vadd.f32 1.0, %v2471_v60 }
 0x55d   :  { %v2475_v1 = vpop.eup %2474  ;;  %2484 = vrcp.f32 %v1902_v61  ;;  %v1903_v3 = vadd.f32 1.0, %v2473_v62 }
 0x55e   :  { %2486 = vrcp.f32 %v1904_v0  ;;  %v1905_v4 = vadd.f32 1.0, %v2475_v1 }
 0x55f   :  { %v2477_v5 = vpop.eup %2476  ;;  %2488 = vrcp.f32 %v1903_v3 }
 0x560   :  { %v2479_v6 = vpop.eup %2478  ;;  %2490 = vrcp.f32 %v1905_v4  ;;  %v1910_v7 = vadd.f32 1.0, %v2477_v5 }
 0x561   :  { %v2481_v8 = vpop.eup %2480  ;;  %v1912_v9 = vadd.f32 1.0, %v2479_v6 }
 0x562   :  { %v2483_v10 = vpop.eup %2482  ;;  %2492 = vrcp.f32 %v1910_v7  ;;  %v1911_v11 = vadd.f32 1.0, %v2481_v8 }
 0x563   :  { %2494 = vrcp.f32 %v1912_v9  ;;  %v1913_v12 = vadd.f32 1.0, %v2483_v10 }
 0x564   :  { %2496 = vrcp.f32 %v1911_v11 }
 0x565   :  { %2498 = vrcp.f32 %v1913_v12 }
 0x56a   :  { %v2485_v63 = vpop.eup %2484 }
 0x56b   :  { %v2487_v13 = vpop.eup %2486  ;;  %1934 = vst [vmem:[%s2789_s6 + $0x20] sm:$0xff] %v2485_v63 }
 0x56c   :  { %v2489_v14 = vpop.eup %2488  ;;  %1936 = vst [vmem:[%s2789_s6 + $0x30] sm:$0xff] %v2487_v13 }
 0x56d   :  { %v2491_v15 = vpop.eup %2490  ;;  %1935 = vst [vmem:[%s2789_s6 + $0x28] sm:$0xff] %v2489_v14 }
 0x56e   :  { %1937 = vst [vmem:[%s2789_s6 + $0x38] sm:$0xff] %v2491_v15 }
 0x56f   :  { %v2493_v16 = vpop.eup %2492 }
 0x570   :  { %v2495_v18 = vpop.eup %2494  ;;  %1942 = vst [vmem:[%s2789_s6 + $0x60] sm:$0xff] %v2493_v16 }
 0x571   :  { %v2497_v19 = vpop.eup %2496  ;;  %1944 = vst [vmem:[%s2789_s6 + $0x70] sm:$0xff] %v2495_v18 }
 0x572   :  { %v2499_v20 = vpop.eup %2498  ;;  %1943 = vst [vmem:[%s2789_s6 + $0x68] sm:$0xff] %v2497_v19 }
 0x573   :  { %1945 = vst [vmem:[%s2789_s6 + $0x78] sm:$0xff] %v2499_v20 }
 0x574   :  { %1954 = vsyncpa [#allocation3], 1 }
 0x575   :  { %1955 = vsyncpa [#allocation5], 1 }

</bundles_post_ra>
